<compile_context>
chip_gen: v5e
topology: v5e:2x2
jax: 0.10.0
libtpu: 0.0.40
codegen_flags: <defaults>
</compile_context>

<pallas_src>
import functools

import jax
import jax.numpy as jnp
from jax.experimental import pallas as pl
from jax.experimental.pallas import tpu as pltpu


# ---------------------------------------------------------------------------
# Fused MHA kernel: one grid step == B_TILE batch elements, all heads at once.
# ---------------------------------------------------------------------------
def _mha_fused_kernel(q_ref, k_ref, v_ref,
                      w_qs_ref, b_qs_ref,
                      w_ks_ref, b_ks_ref,
                      w_vs_ref, b_vs_ref,
                      w_fc_ref, b_fc_ref,
                      *out_refs,
                      n_head, d_k, d_v, inv_temperature, emit_attn,
                      matmul_dtype):
    # Per-grid-step shapes:
    #   q_ref: (B_TILE, Lq, d_model)   k_ref/v_ref: (B_TILE, Lk, d_model)
    #   w_qs/w_ks: (n_head, d_model, d_k)   w_vs: (n_head, d_model, d_v)
    #   b_qs/b_ks: (n_head, 1, d_k)         b_vs: (n_head, 1, d_v)
    #   w_fc: (n_head, d_v, d_model)        b_fc: (1, d_model)
    #   out_ref: (B_TILE, Lq, d_model)  attn_ref: (n_head, B_TILE, Lq, Lk)
    f32 = jnp.float32
    out_ref = out_refs[0]
    attn_ref = out_refs[1] if emit_attn else None

    bt, lq, d_model = q_ref.shape
    lk = k_ref.shape[1]

    mm = (lambda x: x) if matmul_dtype is None else (
        lambda x: x.astype(matmul_dtype))

    # Flatten the batch tile into matmul rows so the MXU sees B_TILE*L rows
    # per projection (instead of just L).
    qf = mm(q_ref[...].reshape(bt * lq, d_model))
    kf = mm(k_ref[...].reshape(bt * lk, d_model))
    vf = mm(v_ref[...].reshape(bt * lk, d_model))

    probs = []
    acc = None
    # n_head is a compile-time constant -> loop unrolls; every per-head weight
    # access is a leading-dim index (pure address offset, no lane slicing).
    for h in range(n_head):
        qh = (jnp.dot(qf, mm(w_qs_ref[h]), preferred_element_type=f32)
              + b_qs_ref[h]).reshape(bt, lq, d_k)
        kh = (jnp.dot(kf, mm(w_ks_ref[h]), preferred_element_type=f32)
              + b_ks_ref[h]).reshape(bt, lk, d_k)
        vh = (jnp.dot(vf, mm(w_vs_ref[h]), preferred_element_type=f32)
              + b_vs_ref[h]).reshape(bt, lk, d_v)

        # Batched q @ k^T without an explicit transpose (contract last dims).
        s = jnp.einsum("bqd,bkd->bqk", mm(qh), mm(kh),
                       preferred_element_type=f32) * inv_temperature
        # TODO(synk): mask would be applied here via jnp.where(mask, -inf, s).
        s = s - jnp.max(s, axis=-1, keepdims=True)
        e = jnp.exp(s)
        a = e * pl.reciprocal(jnp.sum(e, axis=-1, keepdims=True), approx=True)
        if emit_attn:
            probs.append(a)

        o_h = jnp.einsum("bqk,bkd->bqd", mm(a), mm(vh),
                         preferred_element_type=f32)
        # Sum of per-head matmuls == concat(heads) @ w_fc (no lane-dim concat).
        y_h = jnp.dot(mm(o_h.reshape(bt * lq, d_v)), mm(w_fc_ref[h]),
                      preferred_element_type=f32)
        acc = y_h if acc is None else acc + y_h

    y = acc + b_fc_ref[...]                       # (bt*lq, d_model)
    out_ref[...] = y.reshape(bt, lq, d_model).astype(out_ref.dtype)
    if emit_attn:
        # Single coalesced store of all heads' probabilities for this tile.
        attn_ref[...] = jnp.stack(probs, axis=0).astype(attn_ref.dtype)


def multi_head_attention(params, q, k, v, *, n_head, d_k, d_v,
                         b_tile=None, return_attn=True, matmul_dtype=None):
    sz_b, len_q, d_model = q.shape
    _, len_k, _ = k.shape
    _, len_v, _ = v.shape
    assert len_v == len_k, "attention requires len_v == len_k"
    inv_temperature = 1.0 / (float(d_k) ** 0.5)

    # Default batch tile keeps the grid at 2 steps so both v7x TensorCores get
    # work under the "parallel" grid axis; on v5e/v6e the grid is a serial
    # loop, so callers there may prefer b_tile=sz_b (one bigger step).
    if b_tile is None:
        b_tile = max(1, (sz_b + 1) // 2)
    b_tile = min(b_tile, sz_b)
    n_steps = (sz_b + b_tile - 1) // b_tile
    sz_b_pad = n_steps * b_tile
    if sz_b_pad != sz_b:
        pad = ((0, sz_b_pad - sz_b), (0, 0), (0, 0))
        q, k, v = jnp.pad(q, pad), jnp.pad(k, pad), jnp.pad(v, pad)

    # Head-major weight layouts so the kernel indexes heads on a leading dim.
    w_qs = params["w_qs"].reshape(d_model, n_head, d_k).transpose(1, 0, 2)
    w_ks = params["w_ks"].reshape(d_model, n_head, d_k).transpose(1, 0, 2)
    w_vs = params["w_vs"].reshape(d_model, n_head, d_v).transpose(1, 0, 2)
    w_fc = params["w_fc"].reshape(n_head, d_v, d_model)       # pure view
    b_qs = params["b_qs"].reshape(n_head, 1, d_k)
    b_ks = params["b_ks"].reshape(n_head, 1, d_k)
    b_vs = params["b_vs"].reshape(n_head, 1, d_v)
    b_fc = params["b_fc"].reshape(1, d_model)

    kernel = functools.partial(
        _mha_fused_kernel, n_head=n_head, d_k=d_k, d_v=d_v,
        inv_temperature=inv_temperature, emit_attn=return_attn,
        matmul_dtype=matmul_dtype)

    # Weights/biases: index_map ignores the grid index -> stay VMEM-resident.
    def full_spec(arr):
        nd = arr.ndim
        return pl.BlockSpec(arr.shape, lambda b: (0,) * nd)

    in_specs = [
        pl.BlockSpec((b_tile, len_q, d_model), lambda b: (b, 0, 0)),
        pl.BlockSpec((b_tile, len_k, d_model), lambda b: (b, 0, 0)),
        pl.BlockSpec((b_tile, len_k, d_model), lambda b: (b, 0, 0)),
        full_spec(w_qs), full_spec(b_qs),
        full_spec(w_ks), full_spec(b_ks),
        full_spec(w_vs), full_spec(b_vs),
        full_spec(w_fc), full_spec(b_fc),
    ]

    out_spec_o = pl.BlockSpec((b_tile, len_q, d_model), lambda b: (b, 0, 0))
    if return_attn:
        out_shape = (
            jax.ShapeDtypeStruct((sz_b_pad, len_q, d_model), q.dtype),
            jax.ShapeDtypeStruct((n_head, sz_b_pad, len_q, len_k), q.dtype),
        )
        out_specs = (
            out_spec_o,
            pl.BlockSpec((n_head, b_tile, len_q, len_k),
                         lambda b: (0, b, 0, 0)),
        )
    else:
        out_shape = jax.ShapeDtypeStruct((sz_b_pad, len_q, d_model), q.dtype)
        out_specs = out_spec_o

    result = pl.pallas_call(
        kernel,
        out_shape=out_shape,
        grid=(n_steps,),
        in_specs=in_specs,
        out_specs=out_specs,
        compiler_params=pltpu.CompilerParams(
            dimension_semantics=("parallel",)),
    )(q, k, v, w_qs, b_qs, w_ks, b_ks, w_vs, b_vs, w_fc, b_fc)

    if return_attn:
        out, attn = result
        out = out[:sz_b]
        # (n_head, sz_b, Lq, Lk) -> (n_head*sz_b, Lq, Lk): matches PyTorch's
        # head-major flattening (permute(2,0,1,3).view(-1, Lq, Lk)).
        attn = attn[:, :sz_b].reshape(n_head * sz_b, len_q, len_k)
        return out, attn
    return result[:sz_b]


# ---------------------------------------------------------------------------
# Parameter init (weights stored as (d_in, d_out): y = x @ W + b)
# ---------------------------------------------------------------------------
def init_params(key, n_head, d_model, d_k, d_v, dtype=jnp.float32):
    ks = jax.random.split(key, 8)
    s = 0.02
    return {
        "w_qs": s * jax.random.normal(ks[0], (d_model, n_head * d_k), dtype),
        "b_qs": s * jax.random.normal(ks[1], (n_head * d_k,), dtype),
        "w_ks": s * jax.random.normal(ks[2], (d_model, n_head * d_k), dtype),
        "b_ks": s * jax.random.normal(ks[3], (n_head * d_k,), dtype),
        "w_vs": s * jax.random.normal(ks[4], (d_model, n_head * d_v), dtype),
        "b_vs": s * jax.random.normal(ks[5], (n_head * d_v,), dtype),
        "w_fc": s * jax.random.normal(ks[6], (n_head * d_v, d_model), dtype),
        "b_fc": s * jax.random.normal(ks[7], (d_model,), dtype),
    }


# ---------------------------------------------------------------------------
# Pure-JAX reference (for sanity check)
# ---------------------------------------------------------------------------
def reference_mha(params, q, k, v, *, n_head, d_k, d_v):
    sz_b, len_q, d_model = q.shape
    _, len_k, _ = k.shape
    temperature = float(d_k) ** 0.5
    qp = q.reshape(-1, d_model) @ params["w_qs"] + params["b_qs"]
    kp = k.reshape(-1, d_model) @ params["w_ks"] + params["b_ks"]
    vp = v.reshape(-1, d_model) @ params["w_vs"] + params["b_vs"]
    qp = qp.reshape(sz_b, len_q, n_head, d_k).transpose(2, 0, 1, 3).reshape(-1, len_q, d_k)
    kp = kp.reshape(sz_b, len_k, n_head, d_k).transpose(2, 0, 1, 3).reshape(-1, len_k, d_k)
    vp = vp.reshape(sz_b, len_k, n_head, d_v).transpose(2, 0, 1, 3).reshape(-1, len_k, d_v)
    s = jnp.einsum("bqd,bkd->bqk", qp, kp) / temperature
    attn = jax.nn.softmax(s, axis=2)
    out = jnp.einsum("bqk,bkd->bqd", attn, vp)
    out = out.reshape(n_head, sz_b, len_q, d_v).transpose(1, 2, 0, 3).reshape(sz_b, len_q, -1)
    out = out @ params["w_fc"] + params["b_fc"]
    return out, attn


if __name__ == "__main__":
    n_head, d_model, d_k, d_v = 4, 32, 8, 8
    sz_b, seq_len = 4, 8          # -> b_tile=2, grid=(2,): feeds both v7x TCs

    key = jax.random.PRNGKey(0)
    kq, kk, kv, kp = jax.random.split(key, 4)
    q = jax.random.normal(kq, (sz_b, seq_len, d_model), jnp.float32)
    k = jax.random.normal(kk, (sz_b, seq_len, d_model), jnp.float32)
    v = jax.random.normal(kv, (sz_b, seq_len, d_model), jnp.float32)
    params = init_params(kp, n_head, d_model, d_k, d_v)

    out, attn = multi_head_attention(params, q, k, v,
                                     n_head=n_head, d_k=d_k, d_v=d_v)
    out = jax.block_until_ready(out)
    attn = jax.block_until_ready(attn)

    ref_out, ref_attn = reference_mha(params, q, k, v,
                                      n_head=n_head, d_k=d_k, d_v=d_v)
    assert out.shape == (sz_b, seq_len, d_model)
    assert attn.shape == (n_head * sz_b, seq_len, seq_len)
    # Tolerances account for pl.reciprocal(approx=True) in the softmax
    # normalization (~2^-12 relative error).
    assert jnp.allclose(out, ref_out, atol=2e-3, rtol=2e-3), \
        float(jnp.max(jnp.abs(out - ref_out)))
    assert jnp.allclose(attn, ref_attn, atol=2e-3, rtol=2e-3), \
        float(jnp.max(jnp.abs(attn - ref_attn)))

    # Output-only path (skips the attention-prob HBM writeback entirely).
    out_only = multi_head_attention(params, q, k, v,
                                    n_head=n_head, d_k=d_k, d_v=d_v,
                                    return_attn=False)
    out_only = jax.block_until_ready(out_only)
    assert jnp.allclose(out_only, out, atol=1e-6, rtol=1e-6)

    print("KERNEL_OK")
</pallas_src>

<mosaic_0001>
module attributes {stable_mosaic.version = 11 : i64} {
  func.func @_mha_fused_kernel(%arg0: i32, %arg1: memref<2x8x32xf32, #tpu.memory_space<vmem>>, %arg2: memref<2x8x32xf32, #tpu.memory_space<vmem>>, %arg3: memref<2x8x32xf32, #tpu.memory_space<vmem>>, %arg4: memref<4x32x8xf32, #tpu.memory_space<vmem>>, %arg5: memref<4x1x8xf32, #tpu.memory_space<vmem>>, %arg6: memref<4x32x8xf32, #tpu.memory_space<vmem>>, %arg7: memref<4x1x8xf32, #tpu.memory_space<vmem>>, %arg8: memref<4x32x8xf32, #tpu.memory_space<vmem>>, %arg9: memref<4x1x8xf32, #tpu.memory_space<vmem>>, %arg10: memref<4x8x32xf32, #tpu.memory_space<vmem>>, %arg11: memref<1x32xf32, #tpu.memory_space<vmem>>, %arg12: memref<2x8x32xf32, #tpu.memory_space<vmem>>, %arg13: memref<4x2x8x8xf32, #tpu.memory_space<vmem>>) attributes {dimension_semantics = [#tpu.dimension_semantics<parallel>], iteration_bounds = array<i64: 2>, scalar_prefetch = 0 : i64, scratch_operands = 0 : i64, tpu.core_type = #tpu.core_type<tc>, window_params = [{transform_indices = @transform_0, window_bounds = array<i64: 2, 8, 32>}, {transform_indices = @transform_1, window_bounds = array<i64: 2, 8, 32>}, {transform_indices = @transform_2, window_bounds = array<i64: 2, 8, 32>}, {pipeline_mode = #tpu.pipeline_mode<synchronous>, transform_indices = @transform_3, window_bounds = array<i64: 4, 32, 8>}, {pipeline_mode = #tpu.pipeline_mode<synchronous>, transform_indices = @transform_4, window_bounds = array<i64: 4, 1, 8>}, {pipeline_mode = #tpu.pipeline_mode<synchronous>, transform_indices = @transform_5, window_bounds = array<i64: 4, 32, 8>}, {pipeline_mode = #tpu.pipeline_mode<synchronous>, transform_indices = @transform_6, window_bounds = array<i64: 4, 1, 8>}, {pipeline_mode = #tpu.pipeline_mode<synchronous>, transform_indices = @transform_7, window_bounds = array<i64: 4, 32, 8>}, {pipeline_mode = #tpu.pipeline_mode<synchronous>, transform_indices = @transform_8, window_bounds = array<i64: 4, 1, 8>}, {pipeline_mode = #tpu.pipeline_mode<synchronous>, transform_indices = @transform_9, window_bounds = array<i64: 4, 8, 32>}, {pipeline_mode = #tpu.pipeline_mode<synchronous>, transform_indices = @transform_10, window_bounds = array<i64: 1, 32>}, {transform_indices = @transform_11, window_bounds = array<i64: 2, 8, 32>}, {transform_indices = @transform_12, window_bounds = array<i64: 4, 2, 8, 8>}]} {
    %c0 = arith.constant 0 : index
    %c0_0 = arith.constant 0 : index
    %c0_1 = arith.constant 0 : index
    %0 = vector.load %arg1[%c0, %c0_0, %c0_1] : memref<2x8x32xf32, #tpu.memory_space<vmem>>, vector<2x8x32xf32>
    %1 = vector.shape_cast %0 : vector<2x8x32xf32> to vector<16x32xf32>
    %c0_2 = arith.constant 0 : index
    %c0_3 = arith.constant 0 : index
    %c0_4 = arith.constant 0 : index
    %2 = vector.load %arg2[%c0_2, %c0_3, %c0_4] : memref<2x8x32xf32, #tpu.memory_space<vmem>>, vector<2x8x32xf32>
    %3 = vector.shape_cast %2 : vector<2x8x32xf32> to vector<16x32xf32>
    %c0_5 = arith.constant 0 : index
    %c0_6 = arith.constant 0 : index
    %c0_7 = arith.constant 0 : index
    %4 = vector.load %arg3[%c0_5, %c0_6, %c0_7] : memref<2x8x32xf32, #tpu.memory_space<vmem>>, vector<2x8x32xf32>
    %5 = vector.shape_cast %4 : vector<2x8x32xf32> to vector<16x32xf32>
    %c0_8 = arith.constant 0 : index
    %c0_9 = arith.constant 0 : index
    %c0_10 = arith.constant 0 : index
    %6 = vector.load %arg4[%c0_8, %c0_9, %c0_10] : memref<4x32x8xf32, #tpu.memory_space<vmem>>, vector<1x32x8xf32>
    %7 = vector.shape_cast %6 : vector<1x32x8xf32> to vector<32x8xf32>
    %cst = arith.constant dense<0.000000e+00> : vector<16x8xf32>
    %8 = tpu.matmul %1, %7, %cst {dimension_numbers = #tpu.dot_dimension_numbers<[1], [0], [0], [1], [0, 0, 1, 1], [], []>} : vector<16x32xf32>, vector<32x8xf32>, vector<16x8xf32> -> vector<16x8xf32>
    %c0_11 = arith.constant 0 : index
    %c0_12 = arith.constant 0 : index
    %c0_13 = arith.constant 0 : index
    %9 = vector.load %arg5[%c0_11, %c0_12, %c0_13] : memref<4x1x8xf32, #tpu.memory_space<vmem>>, vector<1x1x8xf32>
    %10 = vector.shape_cast %9 : vector<1x1x8xf32> to vector<1x8xf32>
    %11 = vector.broadcast %10 : vector<1x8xf32> to vector<16x8xf32>
    %12 = arith.addf %8, %11 : vector<16x8xf32>
    %13 = vector.shape_cast %12 : vector<16x8xf32> to vector<2x8x8xf32>
    %c0_14 = arith.constant 0 : index
    %c0_15 = arith.constant 0 : index
    %c0_16 = arith.constant 0 : index
    %14 = vector.load %arg6[%c0_14, %c0_15, %c0_16] : memref<4x32x8xf32, #tpu.memory_space<vmem>>, vector<1x32x8xf32>
    %15 = vector.shape_cast %14 : vector<1x32x8xf32> to vector<32x8xf32>
    %cst_17 = arith.constant dense<0.000000e+00> : vector<16x8xf32>
    %16 = tpu.matmul %3, %15, %cst_17 {dimension_numbers = #tpu.dot_dimension_numbers<[1], [0], [0], [1], [0, 0, 1, 1], [], []>} : vector<16x32xf32>, vector<32x8xf32>, vector<16x8xf32> -> vector<16x8xf32>
    %c0_18 = arith.constant 0 : index
    %c0_19 = arith.constant 0 : index
    %c0_20 = arith.constant 0 : index
    %17 = vector.load %arg7[%c0_18, %c0_19, %c0_20] : memref<4x1x8xf32, #tpu.memory_space<vmem>>, vector<1x1x8xf32>
    %18 = vector.shape_cast %17 : vector<1x1x8xf32> to vector<1x8xf32>
    %19 = vector.broadcast %18 : vector<1x8xf32> to vector<16x8xf32>
    %20 = arith.addf %16, %19 : vector<16x8xf32>
    %21 = vector.shape_cast %20 : vector<16x8xf32> to vector<2x8x8xf32>
    %c0_21 = arith.constant 0 : index
    %c0_22 = arith.constant 0 : index
    %c0_23 = arith.constant 0 : index
    %22 = vector.load %arg8[%c0_21, %c0_22, %c0_23] : memref<4x32x8xf32, #tpu.memory_space<vmem>>, vector<1x32x8xf32>
    %23 = vector.shape_cast %22 : vector<1x32x8xf32> to vector<32x8xf32>
    %cst_24 = arith.constant dense<0.000000e+00> : vector<16x8xf32>
    %24 = tpu.matmul %5, %23, %cst_24 {dimension_numbers = #tpu.dot_dimension_numbers<[1], [0], [0], [1], [0, 0, 1, 1], [], []>} : vector<16x32xf32>, vector<32x8xf32>, vector<16x8xf32> -> vector<16x8xf32>
    %c0_25 = arith.constant 0 : index
    %c0_26 = arith.constant 0 : index
    %c0_27 = arith.constant 0 : index
    %25 = vector.load %arg9[%c0_25, %c0_26, %c0_27] : memref<4x1x8xf32, #tpu.memory_space<vmem>>, vector<1x1x8xf32>
    %26 = vector.shape_cast %25 : vector<1x1x8xf32> to vector<1x8xf32>
    %27 = vector.broadcast %26 : vector<1x8xf32> to vector<16x8xf32>
    %28 = arith.addf %24, %27 : vector<16x8xf32>
    %29 = vector.shape_cast %28 : vector<16x8xf32> to vector<2x8x8xf32>
    "tpu.trace_start"() <{level = 10 : i32, message = "bqd,bkd->bqk"}> : () -> ()
    %cst_28 = arith.constant dense<0.000000e+00> : vector<2x8x8xf32>
    %30 = tpu.matmul %13, %21, %cst_28 {dimension_numbers = #tpu.dot_dimension_numbers<[2], [2], [1], [1], [0, 0, 0, 1, 1, 1], [0], [0]>} : vector<2x8x8xf32>, vector<2x8x8xf32>, vector<2x8x8xf32> -> vector<2x8x8xf32>
    "tpu.trace_stop"() : () -> ()
    %cst_29 = arith.constant 0.353553385 : f32
    %31 = vector.broadcast %cst_29 : f32 to vector<2x8x8xf32>
    %32 = arith.mulf %30, %31 : vector<2x8x8xf32>
    %cst_30 = arith.constant dense<0xFF800000> : vector<2x8xf32>
    %33 = vector.multi_reduction <maximumf>, %32, %cst_30 [2] : vector<2x8x8xf32> to vector<2x8xf32>
    %34 = vector.shape_cast %33 : vector<2x8xf32> to vector<2x8x1xf32>
    %35 = vector.broadcast %34 : vector<2x8x1xf32> to vector<2x8x8xf32>
    %36 = arith.subf %32, %35 : vector<2x8x8xf32>
    %37 = math.exp %36 : vector<2x8x8xf32>
    %cst_31 = arith.constant dense<0.000000e+00> : vector<2x8xf32>
    %38 = vector.multi_reduction <add>, %37, %cst_31 [2] : vector<2x8x8xf32> to vector<2x8xf32>
    %39 = vector.shape_cast %38 : vector<2x8xf32> to vector<2x8x1xf32>
    %40 = tpu.reciprocal %39 {approx = true} : vector<2x8x1xf32> -> vector<2x8x1xf32>
    %41 = vector.broadcast %40 : vector<2x8x1xf32> to vector<2x8x8xf32>
    %42 = arith.mulf %37, %41 : vector<2x8x8xf32>
    "tpu.trace_start"() <{level = 10 : i32, message = "bqk,bkd->bqd"}> : () -> ()
    %cst_32 = arith.constant dense<0.000000e+00> : vector<2x8x8xf32>
    %43 = tpu.matmul %42, %29, %cst_32 {dimension_numbers = #tpu.dot_dimension_numbers<[2], [1], [1], [2], [0, 0, 0, 1, 1, 2], [0], [0]>} : vector<2x8x8xf32>, vector<2x8x8xf32>, vector<2x8x8xf32> -> vector<2x8x8xf32>
    "tpu.trace_stop"() : () -> ()
    %44 = vector.shape_cast %43 : vector<2x8x8xf32> to vector<16x8xf32>
    %c0_33 = arith.constant 0 : index
    %c0_34 = arith.constant 0 : index
    %c0_35 = arith.constant 0 : index
    %45 = vector.load %arg10[%c0_33, %c0_34, %c0_35] : memref<4x8x32xf32, #tpu.memory_space<vmem>>, vector<1x8x32xf32>
    %46 = vector.shape_cast %45 : vector<1x8x32xf32> to vector<8x32xf32>
    %cst_36 = arith.constant dense<0.000000e+00> : vector<16x32xf32>
    %47 = tpu.matmul %44, %46, %cst_36 {dimension_numbers = #tpu.dot_dimension_numbers<[1], [0], [0], [1], [0, 0, 1, 1], [], []>} : vector<16x8xf32>, vector<8x32xf32>, vector<16x32xf32> -> vector<16x32xf32>
    %c1 = arith.constant 1 : index
    %c0_37 = arith.constant 0 : index
    %c0_38 = arith.constant 0 : index
    %48 = vector.load %arg4[%c1, %c0_37, %c0_38] : memref<4x32x8xf32, #tpu.memory_space<vmem>>, vector<1x32x8xf32>
    %49 = vector.shape_cast %48 : vector<1x32x8xf32> to vector<32x8xf32>
    %cst_39 = arith.constant dense<0.000000e+00> : vector<16x8xf32>
    %50 = tpu.matmul %1, %49, %cst_39 {dimension_numbers = #tpu.dot_dimension_numbers<[1], [0], [0], [1], [0, 0, 1, 1], [], []>} : vector<16x32xf32>, vector<32x8xf32>, vector<16x8xf32> -> vector<16x8xf32>
    %c1_40 = arith.constant 1 : index
    %c0_41 = arith.constant 0 : index
    %c0_42 = arith.constant 0 : index
    %51 = vector.load %arg5[%c1_40, %c0_41, %c0_42] : memref<4x1x8xf32, #tpu.memory_space<vmem>>, vector<1x1x8xf32>
    %52 = vector.shape_cast %51 : vector<1x1x8xf32> to vector<1x8xf32>
    %53 = vector.broadcast %52 : vector<1x8xf32> to vector<16x8xf32>
    %54 = arith.addf %50, %53 : vector<16x8xf32>
    %55 = vector.shape_cast %54 : vector<16x8xf32> to vector<2x8x8xf32>
    %c1_43 = arith.constant 1 : index
    %c0_44 = arith.constant 0 : index
    %c0_45 = arith.constant 0 : index
    %56 = vector.load %arg6[%c1_43, %c0_44, %c0_45] : memref<4x32x8xf32, #tpu.memory_space<vmem>>, vector<1x32x8xf32>
    %57 = vector.shape_cast %56 : vector<1x32x8xf32> to vector<32x8xf32>
    %cst_46 = arith.constant dense<0.000000e+00> : vector<16x8xf32>
    %58 = tpu.matmul %3, %57, %cst_46 {dimension_numbers = #tpu.dot_dimension_numbers<[1], [0], [0], [1], [0, 0, 1, 1], [], []>} : vector<16x32xf32>, vector<32x8xf32>, vector<16x8xf32> -> vector<16x8xf32>
    %c1_47 = arith.constant 1 : index
    %c0_48 = arith.constant 0 : index
    %c0_49 = arith.constant 0 : index
    %59 = vector.load %arg7[%c1_47, %c0_48, %c0_49] : memref<4x1x8xf32, #tpu.memory_space<vmem>>, vector<1x1x8xf32>
    %60 = vector.shape_cast %59 : vector<1x1x8xf32> to vector<1x8xf32>
    %61 = vector.broadcast %60 : vector<1x8xf32> to vector<16x8xf32>
    %62 = arith.addf %58, %61 : vector<16x8xf32>
    %63 = vector.shape_cast %62 : vector<16x8xf32> to vector<2x8x8xf32>
    %c1_50 = arith.constant 1 : index
    %c0_51 = arith.constant 0 : index
    %c0_52 = arith.constant 0 : index
    %64 = vector.load %arg8[%c1_50, %c0_51, %c0_52] : memref<4x32x8xf32, #tpu.memory_space<vmem>>, vector<1x32x8xf32>
    %65 = vector.shape_cast %64 : vector<1x32x8xf32> to vector<32x8xf32>
    %cst_53 = arith.constant dense<0.000000e+00> : vector<16x8xf32>
    %66 = tpu.matmul %5, %65, %cst_53 {dimension_numbers = #tpu.dot_dimension_numbers<[1], [0], [0], [1], [0, 0, 1, 1], [], []>} : vector<16x32xf32>, vector<32x8xf32>, vector<16x8xf32> -> vector<16x8xf32>
    %c1_54 = arith.constant 1 : index
    %c0_55 = arith.constant 0 : index
    %c0_56 = arith.constant 0 : index
    %67 = vector.load %arg9[%c1_54, %c0_55, %c0_56] : memref<4x1x8xf32, #tpu.memory_space<vmem>>, vector<1x1x8xf32>
    %68 = vector.shape_cast %67 : vector<1x1x8xf32> to vector<1x8xf32>
    %69 = vector.broadcast %68 : vector<1x8xf32> to vector<16x8xf32>
    %70 = arith.addf %66, %69 : vector<16x8xf32>
    %71 = vector.shape_cast %70 : vector<16x8xf32> to vector<2x8x8xf32>
    "tpu.trace_start"() <{level = 10 : i32, message = "bqd,bkd->bqk"}> : () -> ()
    %cst_57 = arith.constant dense<0.000000e+00> : vector<2x8x8xf32>
    %72 = tpu.matmul %55, %63, %cst_57 {dimension_numbers = #tpu.dot_dimension_numbers<[2], [2], [1], [1], [0, 0, 0, 1, 1, 1], [0], [0]>} : vector<2x8x8xf32>, vector<2x8x8xf32>, vector<2x8x8xf32> -> vector<2x8x8xf32>
    "tpu.trace_stop"() : () -> ()
    %cst_58 = arith.constant 0.353553385 : f32
    %73 = vector.broadcast %cst_58 : f32 to vector<2x8x8xf32>
    %74 = arith.mulf %72, %73 : vector<2x8x8xf32>
    %cst_59 = arith.constant dense<0xFF800000> : vector<2x8xf32>
    %75 = vector.multi_reduction <maximumf>, %74, %cst_59 [2] : vector<2x8x8xf32> to vector<2x8xf32>
    %76 = vector.shape_cast %75 : vector<2x8xf32> to vector<2x8x1xf32>
    %77 = vector.broadcast %76 : vector<2x8x1xf32> to vector<2x8x8xf32>
    %78 = arith.subf %74, %77 : vector<2x8x8xf32>
    %79 = math.exp %78 : vector<2x8x8xf32>
    %cst_60 = arith.constant dense<0.000000e+00> : vector<2x8xf32>
    %80 = vector.multi_reduction <add>, %79, %cst_60 [2] : vector<2x8x8xf32> to vector<2x8xf32>
    %81 = vector.shape_cast %80 : vector<2x8xf32> to vector<2x8x1xf32>
    %82 = tpu.reciprocal %81 {approx = true} : vector<2x8x1xf32> -> vector<2x8x1xf32>
    %83 = vector.broadcast %82 : vector<2x8x1xf32> to vector<2x8x8xf32>
    %84 = arith.mulf %79, %83 : vector<2x8x8xf32>
    "tpu.trace_start"() <{level = 10 : i32, message = "bqk,bkd->bqd"}> : () -> ()
    %cst_61 = arith.constant dense<0.000000e+00> : vector<2x8x8xf32>
    %85 = tpu.matmul %84, %71, %cst_61 {dimension_numbers = #tpu.dot_dimension_numbers<[2], [1], [1], [2], [0, 0, 0, 1, 1, 2], [0], [0]>} : vector<2x8x8xf32>, vector<2x8x8xf32>, vector<2x8x8xf32> -> vector<2x8x8xf32>
    "tpu.trace_stop"() : () -> ()
    %86 = vector.shape_cast %85 : vector<2x8x8xf32> to vector<16x8xf32>
    %c1_62 = arith.constant 1 : index
    %c0_63 = arith.constant 0 : index
    %c0_64 = arith.constant 0 : index
    %87 = vector.load %arg10[%c1_62, %c0_63, %c0_64] : memref<4x8x32xf32, #tpu.memory_space<vmem>>, vector<1x8x32xf32>
    %88 = vector.shape_cast %87 : vector<1x8x32xf32> to vector<8x32xf32>
    %cst_65 = arith.constant dense<0.000000e+00> : vector<16x32xf32>
    %89 = tpu.matmul %86, %88, %cst_65 {dimension_numbers = #tpu.dot_dimension_numbers<[1], [0], [0], [1], [0, 0, 1, 1], [], []>} : vector<16x8xf32>, vector<8x32xf32>, vector<16x32xf32> -> vector<16x32xf32>
    %90 = arith.addf %47, %89 : vector<16x32xf32>
    %c2 = arith.constant 2 : index
    %c0_66 = arith.constant 0 : index
    %c0_67 = arith.constant 0 : index
    %91 = vector.load %arg4[%c2, %c0_66, %c0_67] : memref<4x32x8xf32, #tpu.memory_space<vmem>>, vector<1x32x8xf32>
    %92 = vector.shape_cast %91 : vector<1x32x8xf32> to vector<32x8xf32>
    %cst_68 = arith.constant dense<0.000000e+00> : vector<16x8xf32>
    %93 = tpu.matmul %1, %92, %cst_68 {dimension_numbers = #tpu.dot_dimension_numbers<[1], [0], [0], [1], [0, 0, 1, 1], [], []>} : vector<16x32xf32>, vector<32x8xf32>, vector<16x8xf32> -> vector<16x8xf32>
    %c2_69 = arith.constant 2 : index
    %c0_70 = arith.constant 0 : index
    %c0_71 = arith.constant 0 : index
    %94 = vector.load %arg5[%c2_69, %c0_70, %c0_71] : memref<4x1x8xf32, #tpu.memory_space<vmem>>, vector<1x1x8xf32>
    %95 = vector.shape_cast %94 : vector<1x1x8xf32> to vector<1x8xf32>
    %96 = vector.broadcast %95 : vector<1x8xf32> to vector<16x8xf32>
    %97 = arith.addf %93, %96 : vector<16x8xf32>
    %98 = vector.shape_cast %97 : vector<16x8xf32> to vector<2x8x8xf32>
    %c2_72 = arith.constant 2 : index
    %c0_73 = arith.constant 0 : index
    %c0_74 = arith.constant 0 : index
    %99 = vector.load %arg6[%c2_72, %c0_73, %c0_74] : memref<4x32x8xf32, #tpu.memory_space<vmem>>, vector<1x32x8xf32>
    %100 = vector.shape_cast %99 : vector<1x32x8xf32> to vector<32x8xf32>
    %cst_75 = arith.constant dense<0.000000e+00> : vector<16x8xf32>
    %101 = tpu.matmul %3, %100, %cst_75 {dimension_numbers = #tpu.dot_dimension_numbers<[1], [0], [0], [1], [0, 0, 1, 1], [], []>} : vector<16x32xf32>, vector<32x8xf32>, vector<16x8xf32> -> vector<16x8xf32>
    %c2_76 = arith.constant 2 : index
    %c0_77 = arith.constant 0 : index
    %c0_78 = arith.constant 0 : index
    %102 = vector.load %arg7[%c2_76, %c0_77, %c0_78] : memref<4x1x8xf32, #tpu.memory_space<vmem>>, vector<1x1x8xf32>
    %103 = vector.shape_cast %102 : vector<1x1x8xf32> to vector<1x8xf32>
    %104 = vector.broadcast %103 : vector<1x8xf32> to vector<16x8xf32>
    %105 = arith.addf %101, %104 : vector<16x8xf32>
    %106 = vector.shape_cast %105 : vector<16x8xf32> to vector<2x8x8xf32>
    %c2_79 = arith.constant 2 : index
    %c0_80 = arith.constant 0 : index
    %c0_81 = arith.constant 0 : index
    %107 = vector.load %arg8[%c2_79, %c0_80, %c0_81] : memref<4x32x8xf32, #tpu.memory_space<vmem>>, vector<1x32x8xf32>
    %108 = vector.shape_cast %107 : vector<1x32x8xf32> to vector<32x8xf32>
    %cst_82 = arith.constant dense<0.000000e+00> : vector<16x8xf32>
    %109 = tpu.matmul %5, %108, %cst_82 {dimension_numbers = #tpu.dot_dimension_numbers<[1], [0], [0], [1], [0, 0, 1, 1], [], []>} : vector<16x32xf32>, vector<32x8xf32>, vector<16x8xf32> -> vector<16x8xf32>
    %c2_83 = arith.constant 2 : index
    %c0_84 = arith.constant 0 : index
    %c0_85 = arith.constant 0 : index
    %110 = vector.load %arg9[%c2_83, %c0_84, %c0_85] : memref<4x1x8xf32, #tpu.memory_space<vmem>>, vector<1x1x8xf32>
    %111 = vector.shape_cast %110 : vector<1x1x8xf32> to vector<1x8xf32>
    %112 = vector.broadcast %111 : vector<1x8xf32> to vector<16x8xf32>
    %113 = arith.addf %109, %112 : vector<16x8xf32>
    %114 = vector.shape_cast %113 : vector<16x8xf32> to vector<2x8x8xf32>
    "tpu.trace_start"() <{level = 10 : i32, message = "bqd,bkd->bqk"}> : () -> ()
    %cst_86 = arith.constant dense<0.000000e+00> : vector<2x8x8xf32>
    %115 = tpu.matmul %98, %106, %cst_86 {dimension_numbers = #tpu.dot_dimension_numbers<[2], [2], [1], [1], [0, 0, 0, 1, 1, 1], [0], [0]>} : vector<2x8x8xf32>, vector<2x8x8xf32>, vector<2x8x8xf32> -> vector<2x8x8xf32>
    "tpu.trace_stop"() : () -> ()
    %cst_87 = arith.constant 0.353553385 : f32
    %116 = vector.broadcast %cst_87 : f32 to vector<2x8x8xf32>
    %117 = arith.mulf %115, %116 : vector<2x8x8xf32>
    %cst_88 = arith.constant dense<0xFF800000> : vector<2x8xf32>
    %118 = vector.multi_reduction <maximumf>, %117, %cst_88 [2] : vector<2x8x8xf32> to vector<2x8xf32>
    %119 = vector.shape_cast %118 : vector<2x8xf32> to vector<2x8x1xf32>
    %120 = vector.broadcast %119 : vector<2x8x1xf32> to vector<2x8x8xf32>
    %121 = arith.subf %117, %120 : vector<2x8x8xf32>
    %122 = math.exp %121 : vector<2x8x8xf32>
    %cst_89 = arith.constant dense<0.000000e+00> : vector<2x8xf32>
    %123 = vector.multi_reduction <add>, %122, %cst_89 [2] : vector<2x8x8xf32> to vector<2x8xf32>
    %124 = vector.shape_cast %123 : vector<2x8xf32> to vector<2x8x1xf32>
    %125 = tpu.reciprocal %124 {approx = true} : vector<2x8x1xf32> -> vector<2x8x1xf32>
    %126 = vector.broadcast %125 : vector<2x8x1xf32> to vector<2x8x8xf32>
    %127 = arith.mulf %122, %126 : vector<2x8x8xf32>
    "tpu.trace_start"() <{level = 10 : i32, message = "bqk,bkd->bqd"}> : () -> ()
    %cst_90 = arith.constant dense<0.000000e+00> : vector<2x8x8xf32>
    %128 = tpu.matmul %127, %114, %cst_90 {dimension_numbers = #tpu.dot_dimension_numbers<[2], [1], [1], [2], [0, 0, 0, 1, 1, 2], [0], [0]>} : vector<2x8x8xf32>, vector<2x8x8xf32>, vector<2x8x8xf32> -> vector<2x8x8xf32>
    "tpu.trace_stop"() : () -> ()
    %129 = vector.shape_cast %128 : vector<2x8x8xf32> to vector<16x8xf32>
    %c2_91 = arith.constant 2 : index
    %c0_92 = arith.constant 0 : index
    %c0_93 = arith.constant 0 : index
    %130 = vector.load %arg10[%c2_91, %c0_92, %c0_93] : memref<4x8x32xf32, #tpu.memory_space<vmem>>, vector<1x8x32xf32>
    %131 = vector.shape_cast %130 : vector<1x8x32xf32> to vector<8x32xf32>
    %cst_94 = arith.constant dense<0.000000e+00> : vector<16x32xf32>
    %132 = tpu.matmul %129, %131, %cst_94 {dimension_numbers = #tpu.dot_dimension_numbers<[1], [0], [0], [1], [0, 0, 1, 1], [], []>} : vector<16x8xf32>, vector<8x32xf32>, vector<16x32xf32> -> vector<16x32xf32>
    %133 = arith.addf %90, %132 : vector<16x32xf32>
    %c3 = arith.constant 3 : index
    %c0_95 = arith.constant 0 : index
    %c0_96 = arith.constant 0 : index
    %134 = vector.load %arg4[%c3, %c0_95, %c0_96] : memref<4x32x8xf32, #tpu.memory_space<vmem>>, vector<1x32x8xf32>
    %135 = vector.shape_cast %134 : vector<1x32x8xf32> to vector<32x8xf32>
    %cst_97 = arith.constant dense<0.000000e+00> : vector<16x8xf32>
    %136 = tpu.matmul %1, %135, %cst_97 {dimension_numbers = #tpu.dot_dimension_numbers<[1], [0], [0], [1], [0, 0, 1, 1], [], []>} : vector<16x32xf32>, vector<32x8xf32>, vector<16x8xf32> -> vector<16x8xf32>
    %c3_98 = arith.constant 3 : index
    %c0_99 = arith.constant 0 : index
    %c0_100 = arith.constant 0 : index
    %137 = vector.load %arg5[%c3_98, %c0_99, %c0_100] : memref<4x1x8xf32, #tpu.memory_space<vmem>>, vector<1x1x8xf32>
    %138 = vector.shape_cast %137 : vector<1x1x8xf32> to vector<1x8xf32>
    %139 = vector.broadcast %138 : vector<1x8xf32> to vector<16x8xf32>
    %140 = arith.addf %136, %139 : vector<16x8xf32>
    %141 = vector.shape_cast %140 : vector<16x8xf32> to vector<2x8x8xf32>
    %c3_101 = arith.constant 3 : index
    %c0_102 = arith.constant 0 : index
    %c0_103 = arith.constant 0 : index
    %142 = vector.load %arg6[%c3_101, %c0_102, %c0_103] : memref<4x32x8xf32, #tpu.memory_space<vmem>>, vector<1x32x8xf32>
    %143 = vector.shape_cast %142 : vector<1x32x8xf32> to vector<32x8xf32>
    %cst_104 = arith.constant dense<0.000000e+00> : vector<16x8xf32>
    %144 = tpu.matmul %3, %143, %cst_104 {dimension_numbers = #tpu.dot_dimension_numbers<[1], [0], [0], [1], [0, 0, 1, 1], [], []>} : vector<16x32xf32>, vector<32x8xf32>, vector<16x8xf32> -> vector<16x8xf32>
    %c3_105 = arith.constant 3 : index
    %c0_106 = arith.constant 0 : index
    %c0_107 = arith.constant 0 : index
    %145 = vector.load %arg7[%c3_105, %c0_106, %c0_107] : memref<4x1x8xf32, #tpu.memory_space<vmem>>, vector<1x1x8xf32>
    %146 = vector.shape_cast %145 : vector<1x1x8xf32> to vector<1x8xf32>
    %147 = vector.broadcast %146 : vector<1x8xf32> to vector<16x8xf32>
    %148 = arith.addf %144, %147 : vector<16x8xf32>
    %149 = vector.shape_cast %148 : vector<16x8xf32> to vector<2x8x8xf32>
    %c3_108 = arith.constant 3 : index
    %c0_109 = arith.constant 0 : index
    %c0_110 = arith.constant 0 : index
    %150 = vector.load %arg8[%c3_108, %c0_109, %c0_110] : memref<4x32x8xf32, #tpu.memory_space<vmem>>, vector<1x32x8xf32>
    %151 = vector.shape_cast %150 : vector<1x32x8xf32> to vector<32x8xf32>
    %cst_111 = arith.constant dense<0.000000e+00> : vector<16x8xf32>
    %152 = tpu.matmul %5, %151, %cst_111 {dimension_numbers = #tpu.dot_dimension_numbers<[1], [0], [0], [1], [0, 0, 1, 1], [], []>} : vector<16x32xf32>, vector<32x8xf32>, vector<16x8xf32> -> vector<16x8xf32>
    %c3_112 = arith.constant 3 : index
    %c0_113 = arith.constant 0 : index
    %c0_114 = arith.constant 0 : index
    %153 = vector.load %arg9[%c3_112, %c0_113, %c0_114] : memref<4x1x8xf32, #tpu.memory_space<vmem>>, vector<1x1x8xf32>
    %154 = vector.shape_cast %153 : vector<1x1x8xf32> to vector<1x8xf32>
    %155 = vector.broadcast %154 : vector<1x8xf32> to vector<16x8xf32>
    %156 = arith.addf %152, %155 : vector<16x8xf32>
    %157 = vector.shape_cast %156 : vector<16x8xf32> to vector<2x8x8xf32>
    "tpu.trace_start"() <{level = 10 : i32, message = "bqd,bkd->bqk"}> : () -> ()
    %cst_115 = arith.constant dense<0.000000e+00> : vector<2x8x8xf32>
    %158 = tpu.matmul %141, %149, %cst_115 {dimension_numbers = #tpu.dot_dimension_numbers<[2], [2], [1], [1], [0, 0, 0, 1, 1, 1], [0], [0]>} : vector<2x8x8xf32>, vector<2x8x8xf32>, vector<2x8x8xf32> -> vector<2x8x8xf32>
    "tpu.trace_stop"() : () -> ()
    %cst_116 = arith.constant 0.353553385 : f32
    %159 = vector.broadcast %cst_116 : f32 to vector<2x8x8xf32>
    %160 = arith.mulf %158, %159 : vector<2x8x8xf32>
    %cst_117 = arith.constant dense<0xFF800000> : vector<2x8xf32>
    %161 = vector.multi_reduction <maximumf>, %160, %cst_117 [2] : vector<2x8x8xf32> to vector<2x8xf32>
    %162 = vector.shape_cast %161 : vector<2x8xf32> to vector<2x8x1xf32>
    %163 = vector.broadcast %162 : vector<2x8x1xf32> to vector<2x8x8xf32>
    %164 = arith.subf %160, %163 : vector<2x8x8xf32>
    %165 = math.exp %164 : vector<2x8x8xf32>
    %cst_118 = arith.constant dense<0.000000e+00> : vector<2x8xf32>
    %166 = vector.multi_reduction <add>, %165, %cst_118 [2] : vector<2x8x8xf32> to vector<2x8xf32>
    %167 = vector.shape_cast %166 : vector<2x8xf32> to vector<2x8x1xf32>
    %168 = tpu.reciprocal %167 {approx = true} : vector<2x8x1xf32> -> vector<2x8x1xf32>
    %169 = vector.broadcast %168 : vector<2x8x1xf32> to vector<2x8x8xf32>
    %170 = arith.mulf %165, %169 : vector<2x8x8xf32>
    "tpu.trace_start"() <{level = 10 : i32, message = "bqk,bkd->bqd"}> : () -> ()
    %cst_119 = arith.constant dense<0.000000e+00> : vector<2x8x8xf32>
    %171 = tpu.matmul %170, %157, %cst_119 {dimension_numbers = #tpu.dot_dimension_numbers<[2], [1], [1], [2], [0, 0, 0, 1, 1, 2], [0], [0]>} : vector<2x8x8xf32>, vector<2x8x8xf32>, vector<2x8x8xf32> -> vector<2x8x8xf32>
    "tpu.trace_stop"() : () -> ()
    %172 = vector.shape_cast %171 : vector<2x8x8xf32> to vector<16x8xf32>
    %c3_120 = arith.constant 3 : index
    %c0_121 = arith.constant 0 : index
    %c0_122 = arith.constant 0 : index
    %173 = vector.load %arg10[%c3_120, %c0_121, %c0_122] : memref<4x8x32xf32, #tpu.memory_space<vmem>>, vector<1x8x32xf32>
    %174 = vector.shape_cast %173 : vector<1x8x32xf32> to vector<8x32xf32>
    %cst_123 = arith.constant dense<0.000000e+00> : vector<16x32xf32>
    %175 = tpu.matmul %172, %174, %cst_123 {dimension_numbers = #tpu.dot_dimension_numbers<[1], [0], [0], [1], [0, 0, 1, 1], [], []>} : vector<16x8xf32>, vector<8x32xf32>, vector<16x32xf32> -> vector<16x32xf32>
    %176 = arith.addf %133, %175 : vector<16x32xf32>
    %c0_124 = arith.constant 0 : index
    %c0_125 = arith.constant 0 : index
    %177 = vector.load %arg11[%c0_124, %c0_125] : memref<1x32xf32, #tpu.memory_space<vmem>>, vector<1x32xf32>
    %178 = vector.broadcast %177 : vector<1x32xf32> to vector<16x32xf32>
    %179 = arith.addf %176, %178 : vector<16x32xf32>
    %180 = vector.shape_cast %179 : vector<16x32xf32> to vector<2x8x32xf32>
    %c0_126 = arith.constant 0 : index
    %c0_127 = arith.constant 0 : index
    %c0_128 = arith.constant 0 : index
    %181 = vector.load %arg12[%c0_126, %c0_127, %c0_128] : memref<2x8x32xf32, #tpu.memory_space<vmem>>, vector<2x8x32xf32>
    tpu.vector_store %arg12[%c0_126, %c0_127, %c0_128], %180 {strides = array<i32>} : memref<2x8x32xf32, #tpu.memory_space<vmem>>, vector<2x8x32xf32>,
    %182 = vector.shape_cast %42 : vector<2x8x8xf32> to vector<1x2x8x8xf32>
    %183 = vector.shape_cast %84 : vector<2x8x8xf32> to vector<1x2x8x8xf32>
    %184 = vector.shape_cast %127 : vector<2x8x8xf32> to vector<1x2x8x8xf32>
    %185 = vector.shape_cast %170 : vector<2x8x8xf32> to vector<1x2x8x8xf32>
    %186 = tpu.concatenate %182, %183, %184, %185 in 0 : vector<1x2x8x8xf32>, vector<1x2x8x8xf32>, vector<1x2x8x8xf32>, vector<1x2x8x8xf32> -> vector<4x2x8x8xf32>
    %c0_129 = arith.constant 0 : index
    %c0_130 = arith.constant 0 : index
    %c0_131 = arith.constant 0 : index
    %c0_132 = arith.constant 0 : index
    %187 = vector.load %arg13[%c0_129, %c0_130, %c0_131, %c0_132] : memref<4x2x8x8xf32, #tpu.memory_space<vmem>>, vector<4x2x8x8xf32>
    tpu.vector_store %arg13[%c0_129, %c0_130, %c0_131, %c0_132], %186 {strides = array<i32>} : memref<4x2x8x8xf32, #tpu.memory_space<vmem>>, vector<4x2x8x8xf32>,
    return
  }
  func.func @transform_0(%arg0: i32) -> (i32, i32, i32) {
    %c0_i32 = arith.constant 0 : i32
    %c0_i32_0 = arith.constant 0 : i32
    %c0_i32_1 = arith.constant 0 : i32
    return %arg0, %c0_i32, %c0_i32_0 : i32, i32, i32
  }
  func.func @transform_1(%arg0: i32) -> (i32, i32, i32) {
    %c0_i32 = arith.constant 0 : i32
    %c0_i32_0 = arith.constant 0 : i32
    %c0_i32_1 = arith.constant 0 : i32
    return %arg0, %c0_i32, %c0_i32_0 : i32, i32, i32
  }
  func.func @transform_2(%arg0: i32) -> (i32, i32, i32) {
    %c0_i32 = arith.constant 0 : i32
    %c0_i32_0 = arith.constant 0 : i32
    %c0_i32_1 = arith.constant 0 : i32
    return %arg0, %c0_i32, %c0_i32_0 : i32, i32, i32
  }
  func.func @transform_3(%arg0: i32) -> (i32, i32, i32) {
    %c0_i32 = arith.constant 0 : i32
    %c0_i32_0 = arith.constant 0 : i32
    %c0_i32_1 = arith.constant 0 : i32
    %c0_i32_2 = arith.constant 0 : i32
    return %c0_i32, %c0_i32_0, %c0_i32_1 : i32, i32, i32
  }
  func.func @transform_4(%arg0: i32) -> (i32, i32, i32) {
    %c0_i32 = arith.constant 0 : i32
    %c0_i32_0 = arith.constant 0 : i32
    %c0_i32_1 = arith.constant 0 : i32
    %c0_i32_2 = arith.constant 0 : i32
    return %c0_i32, %c0_i32_0, %c0_i32_1 : i32, i32, i32
  }
  func.func @transform_5(%arg0: i32) -> (i32, i32, i32) {
    %c0_i32 = arith.constant 0 : i32
    %c0_i32_0 = arith.constant 0 : i32
    %c0_i32_1 = arith.constant 0 : i32
    %c0_i32_2 = arith.constant 0 : i32
    return %c0_i32, %c0_i32_0, %c0_i32_1 : i32, i32, i32
  }
  func.func @transform_6(%arg0: i32) -> (i32, i32, i32) {
    %c0_i32 = arith.constant 0 : i32
    %c0_i32_0 = arith.constant 0 : i32
    %c0_i32_1 = arith.constant 0 : i32
    %c0_i32_2 = arith.constant 0 : i32
    return %c0_i32, %c0_i32_0, %c0_i32_1 : i32, i32, i32
  }
  func.func @transform_7(%arg0: i32) -> (i32, i32, i32) {
    %c0_i32 = arith.constant 0 : i32
    %c0_i32_0 = arith.constant 0 : i32
    %c0_i32_1 = arith.constant 0 : i32
    %c0_i32_2 = arith.constant 0 : i32
    return %c0_i32, %c0_i32_0, %c0_i32_1 : i32, i32, i32
  }
  func.func @transform_8(%arg0: i32) -> (i32, i32, i32) {
    %c0_i32 = arith.constant 0 : i32
    %c0_i32_0 = arith.constant 0 : i32
    %c0_i32_1 = arith.constant 0 : i32
    %c0_i32_2 = arith.constant 0 : i32
    return %c0_i32, %c0_i32_0, %c0_i32_1 : i32, i32, i32
  }
  func.func @transform_9(%arg0: i32) -> (i32, i32, i32) {
    %c0_i32 = arith.constant 0 : i32
    %c0_i32_0 = arith.constant 0 : i32
    %c0_i32_1 = arith.constant 0 : i32
    %c0_i32_2 = arith.constant 0 : i32
    return %c0_i32, %c0_i32_0, %c0_i32_1 : i32, i32, i32
  }
  func.func @transform_10(%arg0: i32) -> (i32, i32) {
    %c0_i32 = arith.constant 0 : i32
    %c0_i32_0 = arith.constant 0 : i32
    %c0_i32_1 = arith.constant 0 : i32
    return %c0_i32, %c0_i32_0 : i32, i32
  }
  func.func @transform_11(%arg0: i32) -> (i32, i32, i32) {
    %c0_i32 = arith.constant 0 : i32
    %c0_i32_0 = arith.constant 0 : i32
    %c0_i32_1 = arith.constant 0 : i32
    return %arg0, %c0_i32, %c0_i32_0 : i32, i32, i32
  }
  func.func @transform_12(%arg0: i32) -> (i32, i32, i32, i32) {
    %c0_i32 = arith.constant 0 : i32
    %c0_i32_0 = arith.constant 0 : i32
    %c0_i32_1 = arith.constant 0 : i32
    %c0_i32_2 = arith.constant 0 : i32
    return %c0_i32, %arg0, %c0_i32_0, %c0_i32_1 : i32, i32, i32, i32
  }
}

</mosaic_0001>

<bundles_post_ra>
// kernel: tpu_custom_call.1
= control target key start
LH: loop header
LB: loop body
LE: loop exit
PB: predicated region body
PF: predicated region fallthrough
CT: control target
= control target key end

     0   :  { %s2535_s0 = inlined_call_operand.vmem [shape: f32[4,8,32], index: 0, kind: input, shape index: {}]   ;;  %s2536_s1 = inlined_call_operand.vmem [shape: f32[4,8,32], index: 1, kind: input, shape index: {}]   ;;  %s2537_s2 = inlined_call_operand.vmem [shape: f32[4,8,32], index: 2, kind: input, shape index: {}]   ;;  %s2538_s3 = inlined_call_operand.vmem [shape: f32[4,32,8], index: 3, kind: input, shape index: {}]   ;;  %s2539_s4 = inlined_call_operand.vmem [shape: f32[4,1,8], index: 4, kind: input, shape index: {}]   ;;  %s2540_s5 = inlined_call_operand.vmem [shape: f32[4,32,8], index: 5, kind: input, shape index: {}]   ;;  %s2541_s6 = inlined_call_operand.vmem [shape: f32[4,1,8], index: 6, kind: input, shape index: {}]   ;;  %s2542_s7 = inlined_call_operand.vmem [shape: f32[4,32,8], index: 7, kind: input, shape index: {}]   ;;  %s2543_s8 = inlined_call_operand.vmem [shape: f32[4,1,8], index: 8, kind: input, shape index: {}]   ;;  %s2544_s9 = inlined_call_operand.vmem [shape: f32[4,8,32], index: 9, kind: input, shape index: {}]   ;;  %s2545_s10 = inlined_call_operand.vmem [shape: f32[1,32], index: 10, kind: input, shape index: {}]   ;;  %s2546_s11 = inlined_call_operand.hbm [shape: f32[4,8,32], index: 11, kind: output, shape index: {0}]   ;;  %s2547_s12 = inlined_call_operand.hbm [shape: f32[4,4,8,8], index: 12, kind: output, shape index: {1}]  }
   0x1   :  { %2549 = sst [smem:[#allocation11_spill]] %s2535_s0 }
   0x2   :  { %2550 = sst [smem:[#allocation12_spill]] %s2536_s1 }
   0x3   :  { %2551 = sst [smem:[#allocation13_spill]] %s2537_s2 }
   0x4   :  { %2552 = sst [smem:[#allocation14_spill]] %s2538_s3 }
   0x5   :  { %2553 = sst [smem:[#allocation15_spill]] %s2539_s4 }
   0x6   :  { %2554 = sst [smem:[#allocation16_spill]] %s2540_s5 }
   0x7   :  { %2555 = sst [smem:[#allocation17_spill]] %s2541_s6 }
   0x8   :  { %18 = vsyncpa [#allocation3], 0 }
   0x9   :  { %20 = vsyncpa [#allocation3 + $0x1], 0 }
   0xa   :  { %21 = vsyncpa [#allocation5], 0 }
   0xb   :  { %23 = vsyncpa [#allocation5 + $0x1], 0  ;;  %s2074_s21 = smov 0   ;;  %s2076_s22 = smov 0  }
   0xc   :  { %s2078_s23 = smov 0   ;;  %s2080_s24 = smov 0  }
   0xd LB: > { %s2095_s25 = sadd.s32 4294967295, %s1998_s24   ;;  %s1698_s26 = sadd.s32 4294967294, %s1998_s24   ;;  %s1998_s24 = sphi %s2080_s24, %s2571_s24   ;;  %s1994_s23 = sphi %s2078_s23, %s2570_s23   ;;  %s1990_s22 = sphi %s2076_s22, %s2569_s22   ;;  %s1986_s21 = sphi %s2074_s21, %s2568_s21  }
   0xe   : > { %s2099_s27 = sadd.s32 1, %s1998_s24   ;;  %s282_s28 = sadd.s32 1, %s1994_s23 }
   0xf   : > { %s279_s29 = ssub.s32 %s1998_s24, %s2099_s27  ;;  %p292_p0 = scmp.ne.s32.totalorder %s1994_s23, %s1990_s22 }
  0x10   : > { %p280_p1 = scmp.eq.s32.totalorder %s279_s29, 0  ;;  %p293_p2 = scmp.eq.s32.totalorder %s2095_s25, 1 }
  0x11   : > { %p298_p3 = scmp.ne.s32.totalorder %s1990_s22, %s1986_s21  ;;  %p299_p4 = scmp.eq.s32.totalorder %s1698_s26, 1 }
  0x12   : > { %s2110_s30 = scalar_select %p280_p1, %s1994_s23, %s282_s28  }
  0x13   : > { %p2112_p5 = por %p293_p2, %p292_p0  ;;  %p2116_p6 = por %p299_p4, %p298_p3 }
  0x14   : > { %2556 = sst [smem:[#allocation10_spill]] %s2110_s30  ;;  %p1701_p7 = scmp.ge.s32.totalorder %s1998_s24, 1 }
  0x15   : > { %p394_p8 = scmp.lt.s32.totalorder %s1998_s24, 3 }
  0x17   : > { %p395_p9 = pnand %p1701_p7, %p394_p8 }
  0x18   : > { %s2559_s5 = sld [smem:[#allocation16_spill]] (!%p395_p9)  ;;  %s1704_s26 = sshll.u32 (!%p395_p9), %s2095_s25, 1 }
  0x19   : > { %398 = sbr.rel (%p395_p9) target bundleno = 2305 (0x901), region = 64  ;;  %s2560_s3 = sld [smem:[#allocation14_spill]] (!%p395_p9) }
  0x1a   : > { %p452_p10 = scmp.lt.s32.totalorder (!%p395_p9), %s1704_s26, 3  ;;  %s2561_s1 = sld [smem:[#allocation12_spill]] (!%p395_p9) }
  0x1b   : > { %s2562_s0 = sld [smem:[#allocation11_spill]] (!%p395_p9)  ;;  %s2242_s15 = sand.u32 (!%p395_p9), 1, %s1990_s22  }
  0x1c   : > { %s2563_s6 = sld [smem:[#allocation17_spill]] (!%p395_p9)  ;;  %s1703_s19 = sshll.u32 (!%p395_p9), %s2242_s15, 6 }
  0x1d   : > { %s2564_s4 = sld [smem:[#allocation15_spill]] (!%p395_p9)  ;;  %s2254_s20 = scalar_lea.vmem (!%p395_p9), [#allocation4], %s1703_s19 }
  0x1e   : > { %v518_v0 = vld [vmem:[%s2559_s5 + $0x18] sm:$0xff]  ;;  %v517_v1 = vld [vmem:[%s2559_s5 + $0x10] sm:$0xff]  ;;  %v516_v4 = vld [vmem:[%s2559_s5 + $0x8] sm:$0xff]  ;;  %s2573_s26 = smov (!%p452_p10, %s1704_s26), 3  ;;  %vm485_vm0 = vcmask 261120   ;;  %vm589_vm1 = vcmask 64512  }
  0x1f   : > { %v480_v2 = vld [vmem:[%s2560_s3 + $0x18] sm:$0xff]  ;;  %541 = vmatpush.msra.mxu1 %v518_v0  ;;  %1824 = vmatpush.msra.mxu2 %v518_v0  ;;  %v479_v3 = vld [vmem:[%s2560_s3 + $0x10] sm:$0xff]  ;;  %v515_v5 = vld [vmem:[%s2559_s5] sm:$0xff]  ;;  %s2144_s28 = sshll.u32 %s2573_s26, 3  ;;  %s2565_s2 = sld [smem:[#allocation13_spill]] }
  0x20   : > { %504 = vmatpush.msra.mxu0 %v480_v2  ;;  %v478_v6 = vld [vmem:[%s2560_s3 + $0x8] sm:$0xff]  ;;  %v477_v7 = vld [vmem:[%s2560_s3] sm:$0xff]  ;;  %s461_s18 = scalar_lea.vmem %s2561_s1, %s2144_s28  ;;  %v555_v22 = vld [vmem:[%s2542_s7 + $0x18] sm:$0xff]  ;;  %s1519_s1 = scalar_lea.sflag [#allocation3], %s2242_s15 }
  0x21   : > { %542 = vmatpush.msra.mxu1 %v517_v1  ;;  %1825 = vmatpush.msra.mxu2 %v517_v1  ;;  %s455_s30 = scalar_lea.vmem %s2562_s0, %s2144_s28  ;;  %v2157_v8 = vld [vmem:[%s461_s18] sm:$0xff]  ;;  %v2159_v9 = vld [vmem:[%s461_s18 + $0x8] sm:$0xff]  ;;  %v554_v23 = vld [vmem:[%s2542_s7 + $0x10] sm:$0xff]  ;;  %s1702_s0 = sshll.u32 %s2242_s15, 4 }
  0x22   : > { %505 = vmatpush.msra.mxu0 %v479_v3  ;;  %v2161_v10 = vld [vmem:[%s455_s30] sm:$0xff]  ;;  %v2169_v11 = vld [vmem:[%s455_s30 + $0x8] sm:$0xff]  ;;  %v1732_v34 = vld [vmem:[%s2559_s5 + $0x38] sm:$0xff]  ;;  %s1952_s19 = scalar_lea.hbm %s2546_s11, 32 }
  0x23   : > { %543 = vmatpush.msra.mxu1 %v516_v4  ;;  %1826 = vmatpush.msra.mxu2 %v516_v4  ;;  %v1887_v12 = vld [vmem:[%s2563_s6] ss:$0 sm:$0xff]  ;;  %v553_v24 = vld [vmem:[%s2542_s7 + $0x8] sm:$0xff]  ;;  %v1731_v35 = vld [vmem:[%s2559_s5 + $0x30] sm:$0xff] }
  0x24   : > { %506 = vmatpush.msra.mxu0 %v478_v6  ;;  %v1888_v13 = vld [vmem:[%s2564_s4] ss:$0 sm:$0xff]  ;;  %v1730_v36 = vld [vmem:[%s2559_s5 + $0x28] sm:$0xff]  ;;  %v1725_v38 = vld [vmem:[%s2560_s3 + $0x38] sm:$0xff] }
  0x25   : > { %544 = vmatpush.msra.mxu1 %v515_v5  ;;  %1827 = vmatpush.msra.mxu2 %v515_v5  ;;  %v552_v25 = vld [vmem:[%s2542_s7] sm:$0xff]  ;;  %s467_s17 = scalar_lea.vmem %s2565_s2, %s2144_s28  ;;  %v1724_v39 = vld [vmem:[%s2560_s3 + $0x30] sm:$0xff]  ;;  %v1723_v40 = vld [vmem:[%s2560_s3 + $0x28] sm:$0xff]  ;;  %s443_s28 = scalar_lea.vmem [#allocation2], %s1702_s0 }
  0x26   : > { %1712 = vmatmul.msk.f32.vlgmr.msra.gmra.mxu1 %vm485_vm0, %v2157_v8  ;;  %507 = vmatpush.msra.mxu0 %v477_v7  ;;  %v2201_v32 = vld [vmem:[%s467_s17] sm:$0xff]  ;;  %v2205_v33 = vld [vmem:[%s467_s17 + $0x8] sm:$0xff]  ;;  %s2548_s17 = sshll.u32 %s2095_s25, 4  ;;  %s1536_s29 = sshll.u32 %s443_s28, 4  ;;  %s1537_s29 = int_to_ptr.vmem [resolvable:$true] %s1536_s29 }
  0x27   : > { %1713 = vmatmul.msk.f32.vlgmr.msra.gmra.mxu2 %vm485_vm0, %v2159_v9  ;;  %1710 = vmatmul.msk.f32.vlgmr.msra.gmra.mxu0 %vm485_vm0, %v2161_v10  ;;  %v1729_v37 = vld [vmem:[%s2559_s5 + $0x20] sm:$0xff]  ;;  %s1535_s26 = scalar_lea.hbm %s2546_s11, %s2548_s17 }
  0x28   : > { %578 = vmatpush.msrb.mxu2 %v555_v22  ;;  %735 = vmatpush.msrb.mxu1 %v1725_v38  ;;  %v1722_v41 = vld [vmem:[%s2560_s3 + $0x20] sm:$0xff]  ;;  %s1538_s16 = sshll.u32 %s1535_s26, 4  ;;  %s1539_s16 = int_to_ptr.hbm [resolvable:$true] %s1538_s16 }
  0x29   : > { %v1889_v52 = vld [vmem:[%s2543_s8] ss:$0 sm:$0xff]  ;;  %v1890_v57 = vld [vmem:[%s2563_s6 + $0x1] ss:$0 sm:$0xff]  ;;  %s1946_s30 = sshra.s32 %s1539_s16, 4  ;;  %s1947_s30 = int_to_ptr.hbm [resolvable:$true] %s1946_s30 }
  0x2a   : > { %579 = vmatpush.msrb.mxu2 %v554_v23  ;;  %736 = vmatpush.msrb.mxu1 %v1724_v39  ;;  %v1891_v5 = vld [vmem:[%s2564_s4 + $0x1] ss:$0 sm:$0xff]  ;;  %s1948_s2 = scalar_lea.hbm %s1947_s30, 16  ;;  %p1953_p0 = scmp.lt.s32.totalorder %s1947_s30, %s2546_s11 }
  0x2b   : > { %v1892_v38 = vld [vmem:[%s2543_s8 + $0x1] ss:$0 sm:$0xff]  ;;  %p1949_p11 = scmp.ne.s32.totalorder %s1947_s30, %s1948_s2  ;;  %p1954_p1 = scmp.lt.s32.totalorder %s1952_s19, %s1948_s2 }
  0x2c   : > { %580 = vmatpush.msrb.mxu2 %v553_v24  ;;  %737 = vmatpush.msrb.mxu1 %v1723_v40  ;;  %v1737_v24 = vld [vmem:[%s2542_s7 + $0x28] sm:$0xff] }
  0x2d   : > { %p1950_p12 = pnand %p1949_p11, %p2112_p5  ;;  %p1955_p2 = por %p1954_p1, %p1953_p0 }
  0x2e   : > { %581 = vmatpush.msrb.mxu2 %v552_v25  ;;  %738 = vmatpush.msrb.mxu1 %v1722_v41  ;;  %v1736_v25 = vld [vmem:[%s2542_s7 + $0x20] sm:$0xff] }
  0x2f   : > { %1711 = vmatmul.msk.f32.gmra.mxu0 %vm485_vm0, %v2169_v11  ;;  %1714 = vmatmul.msk.f32.vlgmr.msrb.gmra.mxu2 %vm485_vm0, %v2201_v32  ;;  %p1951_p13 = pneg %p1950_p12 }
  0x30   : > { %768 = vmatpush.msra.mxu2 %v1732_v34  ;;  %1727 = vmatmul.msk.f32.vlgmr.msrb.gmra.mxu1 %vm485_vm0, %v2161_v10 }
  0x31   : > { %p1956_p3 = pnand %p1955_p2, %p1951_p13 }
  0x32   : > { %769 = vmatpush.msra.mxu2 %v1731_v35 }
  0x34   : > { %770 = vmatpush.msra.mxu2 %v1730_v36 }
  0x36   : > { %771 = vmatpush.msra.mxu2 %v1729_v37 }
  0x37   : > { %1715 = vmatmul.msk.f32.gmra.mxu2 %vm485_vm0, %v2205_v33 }
  0x38   : > { %1728 = vmatmul.msk.f32.gmra.mxu1 %vm485_vm0, %v2169_v11 }
  0x3f   : > { %1734 = vmatmul.msk.f32.vlgmr.msra.gmra.mxu2 %vm485_vm0, %v2157_v8 }
  0x47   : > { %1735 = vmatmul.msk.f32.gmra.mxu2 %vm485_vm0, %v2159_v9 }
  0xa3   : > { %v546_v14 = vpop.f32.mrf.mxu1 }
  0xa4   : > { %v547_v15 = vadd.f32 %v1887_v12, %v546_v14  ;;  %v509_v16 = vpop.f32.mrf.mxu0  ;;  %v1739_v14 = vld [vmem:[%s2542_s7 + $0x38] sm:$0xff] }
  0xa5   : > { %v510_v17 = vadd.f32 %v1888_v13, %v509_v16 }
  0xa6   : > { %1716 = vmatpush.xpose.msk.msra.mxu3 %vm589_vm1, %v547_v15  ;;  %v1738_v15 = vld [vmem:[%s2542_s7 + $0x30] sm:$0xff] }
  0xa9   : > { %1717 = vmatmul.msk.f32.vlgmr.msra.gmra.mxu3 %vm589_vm1, %v510_v17 }
  0xaa   : > { %v549_v18 = vpop.f32.mrf.mxu2 }
  0xab   : > { %v550_v19 = vadd.f32 %v1887_v12, %v549_v18 }
  0xac   : > { %v512_v20 = vpop.f32.mrf.mxu0 }
  0xad   : > { %v513_v21 = vadd.f32 %v1888_v13, %v512_v20  ;;  %1718 = vmatpush.xpose.msk.msrb.mxu3 %vm589_vm1, %v550_v19  ;;  %v740_v4 = vpop.f32.mrf.mxu1  ;;  %v712_v13 = vld [vmem:[%s2544_s9] sm:$0xff] }
  0xae   : > { %v741_v6 = vadd.f32 %v1891_v5, %v740_v4 }
  0xb1   : > { %1719 = vmatmul.msk.f32.vlgmr.msrb.gmra.mxu3 %vm589_vm1, %v513_v21 }
  0xb2   : > { %v583_v53 = vpop.f32.mrf.mxu2 }
  0xb3   : > { %v584_v54 = vadd.f32 %v1889_v52, %v583_v53 }
  0xb5   : > { %684 = vmatpush.msra.mxu3 %v584_v54  ;;  %v743_v7 = vpop.f32.mrf.mxu1 }
  0xb6   : > { %v744_v12 = vadd.f32 %v1891_v5, %v743_v7  ;;  %v1770_v7 = vld [vmem:[%s2542_s7 + $0x50] sm:$0xff] }
  0xb7   : > { %801 = vmatpush.msrb.mxu3 %v1739_v14  ;;  %v1768_v14 = vld [vmem:[%s2542_s7 + $0x40] sm:$0xff] }
  0xb9   : > { %802 = vmatpush.msrb.mxu3 %v1738_v15 }
  0xba   : > { %v586_v55 = vpop.f32.mrf.mxu2 }
  0xbb   : > { %v587_v56 = vadd.f32 %v1889_v52, %v586_v55  ;;  %803 = vmatpush.msrb.mxu3 %v1737_v24 }
  0xbd   : > { %707 = vmatpush.msrb.mxu0 %v587_v56  ;;  %804 = vmatpush.msrb.mxu3 %v1736_v25 }
  0xc2   : > { %v773_v58 = vpop.f32.mrf.mxu2 }
  0xc3   : > { %v774_v59 = vadd.f32 %v1890_v57, %v773_v58 }
  0xc5   : > { %1743 = vmatpush.xpose.msk.msra.mxu0 %vm589_vm1, %v774_v59 }
  0xca   : > { %v776_v0 = vpop.f32.mrf.mxu2 }
  0xcb   : > { %v777_v2 = vadd.f32 %v1890_v57, %v776_v0  ;;  %v1749_v57 = vld [vmem:[%s2544_s9 + $0x8] sm:$0xff] }
 0x12c   : > { %v613_v26 = vpop.f32.mrf.mxu3 }
 0x12d   : > { %v642_v27 = vmul.f32 0.35355338, %v613_v26 }
 0x12f   : > { %v644_v28 = vsel %vm589_vm1, %v642_v27, -inf }
 0x130   : > { %645 = vmax.xlane.f32.xlu1 %v644_v28 }
 0x134   : > { %v639_v29 = vpop.f32.mrf.mxu3 }
 0x135   : > { %v643_v30 = vmul.f32 0.35355338, %v639_v29 }
 0x137   : > { %v647_v31 = vsel %vm589_vm1, %v643_v30, -inf }
 0x138   : > { %648 = vmax.xlane.f32.xlu0 %v647_v31 }
 0x1a3   : > { %v646_v42 = vpop.xlane.xlu1 %645 }
 0x1a4   : > { %v650_v43 = vsub.f32 %v642_v27, %v646_v42 }
 0x1a6   : > { %v652_v44 = vmul.f32 1.442695, %v650_v43  ;;  %v1764_v43 = vld [vmem:[%s2559_s5 + $0x58] sm:$0xff] }
 0x1a8   : > { %1900 = vpow2.f32 %v652_v44  ;;  %v1763_v44 = vld [vmem:[%s2559_s5 + $0x50] sm:$0xff] }
 0x1ab   : > { %v649_v45 = vpop.xlane.xlu0 %648 }
 0x1ac   : > { %v651_v46 = vsub.f32 %v643_v30, %v649_v45  ;;  %v1762_v45 = vld [vmem:[%s2559_s5 + $0x48] sm:$0xff] }
 0x1ae   : > { %v1901_v47 = vpop.eup %1900  ;;  %v654_v48 = vmul.f32 1.442695, %v651_v46  ;;  %v1761_v46 = vld [vmem:[%s2559_s5 + $0x40] sm:$0xff] }
 0x1af   : > { %v656_v49 = vsel %vm589_vm1, %v1901_v47, 0.0 }
 0x1b0   : > { %1902 = vpow2.f32 %v654_v48  ;;  %657 = vadd.xlane.f32.xlu1 %v656_v49  ;;  %v1756_v48 = vld [vmem:[%s2560_s3 + $0x50] sm:$0xff]  ;;  %v1755_v49 = vld [vmem:[%s2560_s3 + $0x48] sm:$0xff] }
 0x1b6   : > { %v1903_v50 = vpop.eup %1902 }
 0x1b7   : > { %v659_v51 = vsel %vm589_vm1, %v1903_v50, 0.0 }
 0x1b8   : > { %660 = vadd.xlane.f32.xlu0 %v659_v51 }
 0x223   : > { %v658_v60 = vpop.xlane.xlu1 %657 }
 0x224   : > { %1904 = vrcp.f32 %v658_v60  ;;  %v1893_v60 = vld [vmem:[%s2563_s6 + $0x2] ss:$0 sm:$0xff] }
 0x22a   : > { %v1905_v61 = vpop.eup %1904 }
 0x22b   : > { %v664_v62 = vmul.f32 %v1905_v61, %v1901_v47  ;;  %v661_v63 = vpop.xlane.xlu0 %660  ;;  %v1757_v47 = vld [vmem:[%s2560_s3 + $0x58] sm:$0xff]  ;;  %v1894_v61 = vld [vmem:[%s2564_s4 + $0x2] ss:$0 sm:$0xff] }
 0x22c   : > { %1906 = vrcp.f32 %v661_v63 }
 0x22d   : > { %1510 = vst.msk [vmem:[%s2254_s20] sm:$0xff] %vm589_vm1, %v664_v62  ;;  %1720 = vmatmul.msk.f32.vlgmr.msra.gmra.mxu3 %vm589_vm1, %v664_v62 }
 0x22e   : > { %957 = vmatpush.msra.mxu3 %v1749_v57 }
 0x232   : > { %v1907_v1 = vpop.eup %1906 }
 0x233   : > { %v665_v3 = vmul.f32 %v1907_v1, %v1903_v50  ;;  %v1754_v50 = vld [vmem:[%s2560_s3 + $0x40] sm:$0xff] }
 0x235   : > { %1721 = vmatmul.msk.f32.vlgmr.msrb.gmra.mxu0 %vm589_vm1, %v665_v3  ;;  %1511 = vst.msk [vmem:[%s2254_s20 + $0x8] sm:$0xff] %vm589_vm1, %v665_v3  ;;  %1741 = vmatmul.msk.f32.vlgmr.msrb.gmra.mxu3 %vm485_vm0, %v2201_v32 }
 0x236   : > { %1745 = vmatpush.xpose.msk.msrb.mxu0 %vm589_vm1, %v777_v2 }
 0x23d   : > { %1744 = vmatmul.msk.f32.vlgmr.msra.gmra.mxu0 %vm589_vm1, %v741_v6  ;;  %1742 = vmatmul.msk.f32.gmra.mxu3 %vm485_vm0, %v2205_v33  ;;  %v1771_v6 = vld [vmem:[%s2542_s7 + $0x58] sm:$0xff] }
 0x23e   : > { %986 = vmatpush.msra.mxu0 %v712_v13  ;;  %1082 = vmatpush.msrb.mxu3 %v1771_v6  ;;  %v1769_v13 = vld [vmem:[%s2542_s7 + $0x48] sm:$0xff] }
 0x240   : > { %1083 = vmatpush.msrb.mxu3 %v1770_v7 }
 0x242   : > { %1084 = vmatpush.msrb.mxu3 %v1769_v13 }
 0x244   : > { %1085 = vmatpush.msrb.mxu3 %v1768_v14 }
 0x245   : > { %1746 = vmatmul.msk.f32.vlgmr.msrb.gmra.mxu0 %vm589_vm1, %v744_v12 }
 0x2b0   : > { %v686_v16 = vpop.f32.mrf.mxu3 }
 0x2b1   : > { %1752 = vmatmul.msk.f32.vlgmr.msra.gmra.mxu0 %vm589_vm1, %v686_v16 }
 0x2b2   : > { %v709_v17 = vpop.f32.mrf.mxu0 }
 0x2b8   : > { %v806_v39 = vpop.f32.mrf.mxu3 }
 0x2b9   : > { %1753 = vmatmul.msk.f32.gmra.mxu0 %vm589_vm1, %v709_v17  ;;  %v807_v40 = vadd.f32 %v1892_v38, %v806_v39  ;;  %v1794_v39 = vld [vmem:[%s2559_s5 + $0x78] sm:$0xff] }
 0x2ba   : > { %v835_v18 = vpop.f32.mrf.mxu0 }
 0x2bb   : > { %v864_v22 = vmul.f32 0.35355338, %v835_v18  ;;  %906 = vmatpush.msra.mxu1 %v807_v40  ;;  %v1793_v40 = vld [vmem:[%s2559_s5 + $0x70] sm:$0xff] }
 0x2bd   : > { %v866_v23 = vsel %vm589_vm1, %v864_v22, -inf  ;;  %1016 = vmatpush.msrb.mxu1 %v1757_v47 }
 0x2bf   : > { %1017 = vmatpush.msrb.mxu1 %v1756_v48  ;;  %v1784_v48 = vld [vmem:[%s2560_s3 + $0x60] sm:$0xff] }
 0x2c0   : > { %v809_v41 = vpop.f32.mrf.mxu3 }
 0x2c1   : > { %v810_v42 = vadd.f32 %v1892_v38, %v809_v41  ;;  %1018 = vmatpush.msrb.mxu1 %v1755_v49  ;;  %v1787_v41 = vld [vmem:[%s2560_s3 + $0x78] sm:$0xff] }
 0x2c2   : > { %v861_v19 = vpop.f32.mrf.mxu0 }
 0x2c3   : > { %v865_v20 = vmul.f32 0.35355338, %v861_v19  ;;  %929 = vmatpush.msrb.mxu2 %v810_v42  ;;  %1019 = vmatpush.msrb.mxu1 %v1754_v50  ;;  %v1792_v42 = vld [vmem:[%s2559_s5 + $0x68] sm:$0xff] }
 0x2c5   : > { %v869_v21 = vsel %vm589_vm1, %v865_v20, -inf  ;;  %1049 = vmatpush.msra.mxu2 %v1764_v43  ;;  %v1786_v43 = vld [vmem:[%s2560_s3 + $0x70] sm:$0xff] }
 0x2c6   : > { %870 = vmax.xlane.f32.xlu2 %v869_v21 }
 0x2c7   : > { %1050 = vmatpush.msra.mxu2 %v1763_v44  ;;  %v1791_v44 = vld [vmem:[%s2559_s5 + $0x60] sm:$0xff] }
 0x2c9   : > { %1051 = vmatpush.msra.mxu2 %v1762_v45 }
 0x2cb   : > { %1052 = vmatpush.msra.mxu2 %v1761_v46  ;;  %v1785_v46 = vld [vmem:[%s2560_s3 + $0x68] sm:$0xff] }
 0x2ce   : > { %867 = vmax.xlane.f32.xlu2 %v866_v23 }
 0x32e   : > { %v2355_v12 = vpop.f32.mrf.mxu0 }
 0x336   : > { %v2365_v15 = vpop.f32.mrf.mxu0 }
 0x339   : > { %v871_v26 = vpop.xlane.xlu2 %870 }
 0x33a   : > { %v873_v27 = vsub.f32 %v865_v20, %v871_v26 }
 0x33c   : > { %v876_v28 = vmul.f32 1.442695, %v873_v27 }
 0x33e   : > { %1908 = vpow2.f32 %v876_v28 }
 0x341   : > { %v868_v29 = vpop.xlane.xlu2 %867 }
 0x342   : > { %v872_v30 = vsub.f32 %v864_v22, %v868_v29 }
 0x344   : > { %v1909_v31 = vpop.eup %1908  ;;  %v874_v34 = vmul.f32 1.442695, %v872_v30 }
 0x345   : > { %v881_v35 = vsel %vm589_vm1, %v1909_v31, 0.0 }
 0x346   : > { %1910 = vpow2.f32 %v874_v34  ;;  %882 = vadd.xlane.f32.xlu0 %v881_v35 }
 0x34c   : > { %v1911_v36 = vpop.eup %1910 }
 0x34d   : > { %v878_v37 = vsel %vm589_vm1, %v1911_v36, 0.0 }
 0x34e   : > { %879 = vadd.xlane.f32.xlu1 %v878_v37 }
 0x3b9   : > { %v883_v51 = vpop.xlane.xlu0 %882 }
 0x3ba   : > { %1912 = vrcp.f32 %v883_v51 }
 0x3c0   : > { %v1913_v52 = vpop.eup %1912 }
 0x3c1   : > { %v887_v53 = vmul.f32 %v1913_v52, %v1909_v31  ;;  %v880_v54 = vpop.xlane.xlu1 %879 }
 0x3c2   : > { %1914 = vrcp.f32 %v880_v54  ;;  %v1896_v54 = vld [vmem:[%s2563_s6 + $0x3] ss:$0 sm:$0xff] }
 0x3c3   : > { %1513 = vst.msk [vmem:[%s2254_s20 + $0x18] sm:$0xff] %vm589_vm1, %v887_v53  ;;  %1748 = vmatmul.msk.f32.vlgmr.msrb.gmra.mxu2 %vm589_vm1, %v887_v53 }
 0x3c8   : > { %v1915_v55 = vpop.eup %1914 }
 0x3c9   : > { %v886_v56 = vmul.f32 %v1915_v55, %v1911_v36  ;;  %v1895_v36 = vld [vmem:[%s2543_s8 + $0x2] ss:$0 sm:$0xff] }
 0x3cb   : > { %1512 = vst.msk [vmem:[%s2254_s20 + $0x10] sm:$0xff] %vm589_vm1, %v886_v56  ;;  %1747 = vmatmul.msk.f32.vlgmr.msra.gmra.mxu1 %vm589_vm1, %v886_v56  ;;  %1766 = vmatmul.msk.f32.vlgmr.msra.gmra.mxu2 %vm485_vm0, %v2157_v8 }
 0x3d3   : > { %1767 = vmatmul.msk.f32.gmra.mxu2 %vm485_vm0, %v2159_v9  ;;  %1759 = vmatmul.msk.f32.vlgmr.msrb.gmra.mxu1 %vm485_vm0, %v2161_v10 }
 0x3db   : > { %1760 = vmatmul.msk.f32.gmra.mxu1 %vm485_vm0, %v2169_v11 }
 0x446   : > { %v931_v58 = vpop.f32.mrf.mxu2 }
 0x448   : > { %v908_v59 = vpop.f32.mrf.mxu1 }
 0x449   : > { %1750 = vmatmul.msk.f32.vlgmr.msra.gmra.mxu3 %vm589_vm1, %v908_v59 }
 0x44a   : > { %1303 = vmatpush.msra.mxu3 %v1794_v39 }
 0x44c   : > { %1304 = vmatpush.msra.mxu3 %v1793_v40 }
 0x44e   : > { %v1054_v62 = vpop.f32.mrf.mxu2  ;;  %1305 = vmatpush.msra.mxu3 %v1792_v42 }
 0x44f   : > { %v1055_v63 = vadd.f32 %v1893_v60, %v1054_v62 }
 0x450   : > { %v1021_v0 = vpop.f32.mrf.mxu1  ;;  %1306 = vmatpush.msra.mxu3 %v1791_v44  ;;  %v1899_v44 = vld [vmem:[%s2545_s10] ss:$0 sm:$0xff] }
 0x451   : > { %1751 = vmatmul.msk.f32.gmra.mxu3 %vm589_vm1, %v931_v58  ;;  %v1022_v1 = vadd.f32 %v1894_v61, %v1021_v0  ;;  %1775 = vmatpush.xpose.msk.msrb.mxu0 %vm589_vm1, %v1055_v63  ;;  %v1801_v0 = vld [vmem:[%s2542_s7 + $0x78] sm:$0xff] }
 0x454   : > { %1776 = vmatmul.msk.f32.vlgmr.msrb.gmra.mxu0 %vm589_vm1, %v1022_v1 }
 0x456   : > { %v1057_v2 = vpop.f32.mrf.mxu2 }
 0x457   : > { %v1058_v3 = vadd.f32 %v1893_v60, %v1057_v2  ;;  %v1897_v60 = vld [vmem:[%s2564_s4 + $0x3] ss:$0 sm:$0xff] }
 0x458   : > { %v1024_v4 = vpop.f32.mrf.mxu1 }
 0x459   : > { %v1025_v5 = vadd.f32 %v1894_v61, %v1024_v4  ;;  %1777 = vmatpush.xpose.msk.msra.mxu1 %vm589_vm1, %v1058_v3  ;;  %1773 = vmatmul.msk.f32.vlgmr.msrb.gmra.mxu3 %vm485_vm0, %v2201_v32 }
 0x45c   : > { %1778 = vmatmul.msk.f32.vlgmr.msra.gmra.mxu1 %vm589_vm1, %v1025_v5 }
 0x461   : > { %1774 = vmatmul.msk.f32.gmra.mxu3 %vm485_vm0, %v2205_v33 }
 0x469   : > { %1796 = vmatmul.msk.f32.vlgmr.msra.gmra.mxu3 %vm485_vm0, %v2157_v8 }
 0x471   : > { %1797 = vmatmul.msk.f32.gmra.mxu3 %vm485_vm0, %v2159_v9  ;;  %v1781_v9 = vld [vmem:[%s2544_s9 + $0x10] sm:$0xff] }
 0x472   : > { %1238 = vmatpush.msrb.mxu1 %v1781_v9 }
 0x4cc   : > { %v2373_v34 = vpop.f32.mrf.mxu3 }
 0x4cd   : > { %v989_v1 = vadd.f32 %v2355_v12, %v2373_v34  ;;  %v1800_v12 = vld [vmem:[%s2542_s7 + $0x70] sm:$0xff] }
 0x4d1   : > { %v1116_v16 = vpop.f32.mrf.mxu0 }
 0x4d2   : > { %v1145_v17 = vmul.f32 0.35355338, %v1116_v16 }
 0x4d4   : > { %v1147_v18 = vsel %vm589_vm1, %v1145_v17, -inf  ;;  %v2375_v35 = vpop.f32.mrf.mxu3 }
 0x4d5   : > { %1148 = vmax.xlane.f32.xlu2 %v1147_v18  ;;  %v992_v4 = vadd.f32 %v2365_v15, %v2375_v35  ;;  %v1799_v15 = vld [vmem:[%s2542_s7 + $0x68] sm:$0xff] }
 0x4d9   : > { %v1142_v19 = vpop.f32.mrf.mxu1 }
 0x4da   : > { %v1146_v20 = vmul.f32 0.35355338, %v1142_v19  ;;  %v1798_v19 = vld [vmem:[%s2542_s7 + $0x60] sm:$0xff] }
 0x4dc   : > { %v1150_v21 = vsel %vm589_vm1, %v1146_v20, -inf  ;;  %v1087_v37 = vpop.f32.mrf.mxu3 }
 0x4dd   : > { %1151 = vmax.xlane.f32.xlu0 %v1150_v21  ;;  %v1088_v38 = vadd.f32 %v1895_v36, %v1087_v37 }
 0x4df   : > { %1187 = vmatpush.msrb.mxu2 %v1088_v38 }
 0x4e1   : > { %1270 = vmatpush.msra.mxu2 %v1787_v41  ;;  %v1811_v41 = vld [vmem:[%s2544_s9 + $0x18] sm:$0xff] }
 0x4e3   : > { %1271 = vmatpush.msra.mxu2 %v1786_v43 }
 0x4e4   : > { %v1090_v45 = vpop.f32.mrf.mxu3 }
 0x4e5   : > { %v1091_v47 = vadd.f32 %v1895_v36, %v1090_v45  ;;  %1272 = vmatpush.msra.mxu2 %v1785_v46 }
 0x4e7   : > { %1210 = vmatpush.msra.mxu0 %v1091_v47  ;;  %1273 = vmatpush.msra.mxu2 %v1784_v48 }
 0x4e9   : > { %1336 = vmatpush.msrb.mxu0 %v1801_v0 }
 0x4eb   : > { %1337 = vmatpush.msrb.mxu0 %v1800_v12 }
 0x4ec   : > { %v1308_v55 = vpop.f32.mrf.mxu3 }
 0x4ed   : > { %v1309_v56 = vadd.f32 %v1896_v54, %v1308_v55  ;;  %1338 = vmatpush.msrb.mxu0 %v1799_v15 }
 0x4ef   : > { %1805 = vmatpush.xpose.msk.msra.mxu1 %vm589_vm1, %v1309_v56  ;;  %1339 = vmatpush.msrb.mxu0 %v1798_v19 }
 0x4f4   : > { %v1311_v57 = vpop.f32.mrf.mxu3 }
 0x4f5   : > { %v1312_v58 = vadd.f32 %v1896_v54, %v1311_v57 }
 0x548   : > { %v1149_v22 = vpop.xlane.xlu2 %1148 }
 0x549   : > { %v1153_v23 = vsub.f32 %v1145_v17, %v1149_v22 }
 0x54b   : > { %v1155_v24 = vmul.f32 1.442695, %v1153_v23 }
 0x54d   : > { %1916 = vpow2.f32 %v1155_v24 }
 0x550   : > { %v1152_v25 = vpop.xlane.xlu0 %1151 }
 0x551   : > { %v1154_v26 = vsub.f32 %v1146_v20, %v1152_v25 }
 0x553   : > { %v1917_v27 = vpop.eup %1916  ;;  %v1157_v28 = vmul.f32 1.442695, %v1154_v26 }
 0x554   : > { %v1159_v29 = vsel %vm589_vm1, %v1917_v27, 0.0 }
 0x555   : > { %1918 = vpow2.f32 %v1157_v28  ;;  %1160 = vadd.xlane.f32.xlu1 %v1159_v29 }
 0x55b   : > { %v1919_v30 = vpop.eup %1918 }
 0x55c   : > { %v1162_v31 = vsel %vm589_vm1, %v1919_v30, 0.0 }
 0x55d   : > { %1163 = vadd.xlane.f32.xlu2 %v1162_v31 }
 0x5c8   : > { %v1161_v49 = vpop.xlane.xlu1 %1160 }
 0x5c9   : > { %1920 = vrcp.f32 %v1161_v49 }
 0x5cf   : > { %v1921_v50 = vpop.eup %1920 }
 0x5d0   : > { %v1167_v51 = vmul.f32 %v1921_v50, %v1917_v27  ;;  %v1164_v52 = vpop.xlane.xlu2 %1163 }
 0x5d1   : > { %1922 = vrcp.f32 %v1164_v52 }
 0x5d2   : > { %1514 = vst.msk [vmem:[%s2254_s20 + $0x20] sm:$0xff] %vm589_vm1, %v1167_v51  ;;  %1779 = vmatmul.msk.f32.vlgmr.msrb.gmra.mxu2 %vm589_vm1, %v1167_v51 }
 0x5d3   : > { %1807 = vmatpush.xpose.msk.msrb.mxu2 %vm589_vm1, %v1312_v58 }
 0x5d7   : > { %v1923_v8 = vpop.eup %1922 }
 0x5d8   : > { %v1168_v53 = vmul.f32 %v1923_v8, %v1919_v30 }
 0x5da   : > { %1515 = vst.msk [vmem:[%s2254_s20 + $0x28] sm:$0xff] %vm589_vm1, %v1168_v53  ;;  %1780 = vmatmul.msk.f32.vlgmr.msra.gmra.mxu0 %vm589_vm1, %v1168_v53  ;;  %1789 = vmatmul.msk.f32.vlgmr.msra.gmra.mxu2 %vm485_vm0, %v2161_v10 }
 0x5e2   : > { %1790 = vmatmul.msk.f32.gmra.mxu2 %vm485_vm0, %v2169_v11  ;;  %1803 = vmatmul.msk.f32.vlgmr.msrb.gmra.mxu0 %vm485_vm0, %v2201_v32  ;;  %v1898_v32 = vld [vmem:[%s2543_s8 + $0x3] ss:$0 sm:$0xff] }
 0x5ea   : > { %1804 = vmatmul.msk.f32.gmra.mxu0 %vm485_vm0, %v2205_v33 }
 0x655   : > { %v1189_v10 = vpop.f32.mrf.mxu2 }
 0x656   : > { %1782 = vmatmul.msk.f32.vlgmr.msrb.gmra.mxu1 %vm589_vm1, %v1189_v10 }
 0x657   : > { %v1212_v11 = vpop.f32.mrf.mxu0  ;;  %1492 = vmatpush.msrb.mxu1 %v1811_v41 }
 0x65d   : > { %v1275_v59 = vpop.f32.mrf.mxu2 }
 0x65e   : > { %1783 = vmatmul.msk.f32.gmra.mxu1 %vm589_vm1, %v1212_v11  ;;  %v1276_v61 = vadd.f32 %v1897_v60, %v1275_v59 }
 0x65f   : > { %v1341_v33 = vpop.f32.mrf.mxu0 }
 0x660   : > { %v1342_v30 = vadd.f32 %v1898_v32, %v1341_v33 }
 0x662   : > { %1441 = vmatpush.msrb.mxu3 %v1342_v30 }
 0x665   : > { %v1278_v62 = vpop.f32.mrf.mxu2 }
 0x666   : > { %v1279_v63 = vadd.f32 %v1897_v60, %v1278_v62  ;;  %1806 = vmatmul.msk.f32.vlgmr.msra.gmra.mxu1 %vm589_vm1, %v1276_v61 }
 0x667   : > { %v1344_v31 = vpop.f32.mrf.mxu0 }
 0x668   : > { %1808 = vmatmul.msk.f32.vlgmr.msrb.gmra.mxu2 %vm589_vm1, %v1279_v63  ;;  %v1345_v34 = vadd.f32 %v1898_v32, %v1344_v31 }
 0x66a   : > { %1464 = vmatpush.msra.mxu0 %v1345_v34 }
 0x6d3   : > { %v1240_v2 = vpop.f32.mrf.mxu1 }
 0x6d4   : > { %v1246_v3 = vadd.f32 %v1240_v2, %v989_v1 }
 0x6db   : > { %v1243_v5 = vpop.f32.mrf.mxu1 }
 0x6dc   : > { %v2440_v6 = vadd.f32 %v1243_v5, %v992_v4 }
 0x6e3   : > { %v1370_v7 = vpop.f32.mrf.mxu1 }
 0x6e4   : > { %v1399_v13 = vmul.f32 0.35355338, %v1370_v7 }
 0x6e6   : > { %v1401_v14 = vsel %vm589_vm1, %v1399_v13, -inf }
 0x6e7   : > { %1402 = vmax.xlane.f32.xlu0 %v1401_v14 }
 0x6eb   : > { %v1396_v16 = vpop.f32.mrf.mxu2 }
 0x6ec   : > { %v1400_v17 = vmul.f32 0.35355338, %v1396_v16 }
 0x6ee   : > { %v1404_v18 = vsel %vm589_vm1, %v1400_v17, -inf }
 0x6ef   : > { %1405 = vmax.xlane.f32.xlu1 %v1404_v18 }
 0x75a   : > { %v1403_v20 = vpop.xlane.xlu0 %1402 }
 0x75b   : > { %v1407_v21 = vsub.f32 %v1399_v13, %v1403_v20 }
 0x75d   : > { %v1409_v22 = vmul.f32 1.442695, %v1407_v21 }
 0x75f   : > { %1924 = vpow2.f32 %v1409_v22 }
 0x762   : > { %v1406_v23 = vpop.xlane.xlu1 %1405 }
 0x763   : > { %v1408_v24 = vsub.f32 %v1400_v17, %v1406_v23 }
 0x765   : > { %v1925_v25 = vpop.eup %1924  ;;  %v1411_v26 = vmul.f32 1.442695, %v1408_v24 }
 0x766   : > { %v1413_v27 = vsel %vm589_vm1, %v1925_v25, 0.0 }
 0x767   : > { %1926 = vpow2.f32 %v1411_v26  ;;  %1414 = vadd.xlane.f32.xlu2 %v1413_v27 }
 0x76d   : > { %v1927_v28 = vpop.eup %1926 }
 0x76e   : > { %v1416_v29 = vsel %vm589_vm1, %v1927_v28, 0.0 }
 0x76f   : > { %1417 = vadd.xlane.f32.xlu0 %v1416_v29 }
 0x7da   : > { %v1415_v35 = vpop.xlane.xlu2 %1414 }
 0x7db   : > { %1928 = vrcp.f32 %v1415_v35 }
 0x7e1   : > { %v1929_v36 = vpop.eup %1928 }
 0x7e2   : > { %v1421_v37 = vmul.f32 %v1929_v36, %v1925_v25  ;;  %v1418_v38 = vpop.xlane.xlu0 %1417 }
 0x7e3   : > { %1930 = vrcp.f32 %v1418_v38 }
 0x7e4   : > { %1516 = vst.msk [vmem:[%s2254_s20 + $0x30] sm:$0xff] %vm589_vm1, %v1421_v37  ;;  %1809 = vmatmul.msk.f32.vlgmr.msrb.gmra.mxu3 %vm589_vm1, %v1421_v37 }
 0x7e9   : > { %v1931_v39 = vpop.eup %1930 }
 0x7ea   : > { %v1422_v40 = vmul.f32 %v1931_v39, %v1927_v28 }
 0x7ec   : > { %1517 = vst.msk [vmem:[%s2254_s20 + $0x38] sm:$0xff] %vm589_vm1, %v1422_v40  ;;  %1810 = vmatmul.msk.f32.vlgmr.msra.gmra.mxu0 %vm589_vm1, %v1422_v40 }
 0x867   : > { %v1443_v42 = vpop.f32.mrf.mxu3 }
 0x868   : > { %1812 = vmatmul.msk.f32.vlgmr.msrb.gmra.mxu1 %vm589_vm1, %v1443_v42 }
 0x869   : > { %v1466_v43 = vpop.f32.mrf.mxu0 }
 0x870   : > { %1813 = vmatmul.msk.f32.gmra.mxu1 %vm589_vm1, %v1466_v43 }
 0x8e5   : > { %v1494_v45 = vpop.f32.mrf.mxu1 }
 0x8e6   : > { %v1500_v46 = vadd.f32 %v1494_v45, %v1246_v3 }
 0x8e8   : > { %v1506_v47 = vadd.f32 %v1899_v44, %v1500_v46 }
 0x8ea   : > { %1508 = vst.msk [vmem:[%s443_s28] sm:$0xff] %vm485_vm0, %v1506_v47 }
 0x8ed   : > { %v1497_v48 = vpop.f32.mrf.mxu1 }
 0x8ee   : > { %v1501_v49 = vadd.f32 %v1497_v48, %v2440_v6 }
 0x8f0   : > { %v1507_v50 = vadd.f32 %v1899_v44, %v1501_v49 }
 0x8f2   : > { %1509 = vst.msk [vmem:[%s443_s28 + $0x8] sm:$0xff] %vm485_vm0, %v1507_v50 }
 0x8f3   : > { %1959 = shalt.err (!%p1956_p3)
}
 0x8f4   : > { %s2000_s28 = smov 128   ;;  %s2001_s3 = smov 8  }
 0x8f5   : > { %1828 = dma.vmem_to_hbm [thread:$0]  (%p2112_p5), %s1537_s29, 256, %s1539_s16, %s1519_s1, %s2000_s28, %s2000_s28, %s2001_s3  }
 0x8f6   : > { %s1524_s4 = scalar_lea.sflag [#allocation5], %s2242_s15 }
 0x8f7   : > { %s2566_s5 = sshll.u32 %s2095_s25, 4  ;;  %s1563_s17 = sshll.u32 %s2254_s20, 4  ;;  %s1564_s17 = int_to_ptr.vmem [resolvable:$true] %s1563_s17 }
 0x8f8   : > { %s1552_s2 = scalar_lea.hbm %s2547_s12, %s2566_s5  ;;  %s2002_s3 = smov 256  }
 0x8f9   : > { %s1565_s30 = sshll.u32 %s1552_s2, 4  ;;  %1829 = sst [smem:[#allocation7]] (%p2112_p5), %s2002_s3  ;;  %s1566_s30 = int_to_ptr.hbm [resolvable:$true] %s1565_s30 }
 0x8fa   : > { %s2003_s25 = smov 512   ;;  %s2004_s6 = smov 2  }
 0x8fb   : > { %1830 = sst [smem:[#allocation7 + $0x1]] (%p2112_p5), %s2003_s25  ;;  %s2005_s15 = smov 128  }
 0x8fc   : > { %1831 = sst [smem:[#allocation7 + $0x2]] (%p2112_p5), %s2004_s6  ;;  %s2006_s5 = smov 8  }
 0x8fd   : > { %1832 = sst [smem:[#allocation7 + $0x3]] (%p2112_p5), %s2005_s15  ;;  %s2007_s20 = smov [#allocation6]  }
 0x8fe   : > { %1833 = sst [smem:[#allocation7 + $0x4]] (%p2112_p5), %s2005_s15  ;;  %s2008_s29 = smov 0  }
 0x8ff   : > { %1834 = sst [smem:[#allocation7 + $0x5]] (%p2112_p5), %s2006_s5 }
 0x900   : > { %1835 = dma.general (%p2112_p5), %s1564_s17, 1024, %s1566_s30, %s1524_s4, %s2007_s20, [#allocation7], %s2008_s29, 0  }
 0x901 PF: > { %p1845_p4 = scmp.ge.s32.totalorder %s1998_s24, 2  ;;  %s1593_s16 = sand.u32 1, %s1986_s21  }
 0x902   : > { %s1594_s1 = scalar_lea.sflag [#allocation3], %s1593_s16 }
 0x903   : > { %p1839_p7 = pnand %p1845_p4, %p2116_p6 }
 0x905   : > { %p1840_p8 = pneg %p1839_p7 }
 0x907   : > { %1977 = dma.done.wait (%p1840_p8), %s1594_s1, 256  }
 0x908   : > { %1979 = vsyncadd (%p1840_p8), %s1594_s1, 4294967040  ;;  %s1604_s18 = scalar_lea.sflag [#allocation5], %s1593_s16 }
 0x909   : > { %1981 = dma.done.wait (%p1840_p8), %s1604_s18, 1024  }
 0x90a   : > { %1983 = vsyncadd (%p1840_p8), %s1604_s18, 4294966272  ;;  %s2567_s13 = sld [smem:[#allocation10_spill]]  ;;  %p26_p5 = scmp.ge.s32.totalorder %s2099_s27, 4  }
 0x90b   : > { %s2568_s21 = smov %s1990_s22  ;;  %s2569_s22 = smov %s1994_s23 }
 0x90c   : > { %s2571_s24 = smov %s2099_s27  ;;  %28 = sbr.rel (!%p26_p5) target bundleno = 13 (0xd), region = 148 }
 0x910   : > { %s2570_s23 = smov %s2567_s13 }
 0x911   :  { %1610 = vsyncpa [#allocation3], 1 }
 0x912   :  { %1612 = vsyncpa [#allocation3 + $0x1], 1 }
 0x913   :  { %1613 = vsyncpa [#allocation5], 1 }
 0x914   :  { %1615 = vsyncpa [#allocation5 + $0x1], 1 }

</bundles_post_ra>
